<compile_context>
chip_gen: v7x
topology: tpu7x:2x2x1
jax: 0.10.0
libtpu: 0.0.40
codegen_flags: <defaults>
</compile_context>

<pallas_src>
import functools

import jax
import jax.numpy as jnp
from jax import lax
from jax.experimental import pallas as pl
from jax.experimental.pallas import tpu as pltpu


def _round_up(x, m):
    return (x + m - 1) // m * m


def _stacked_rnn_kernel(*refs, with_h0):
    if with_h0:
        (x_ref, wxh0_ref, wxh_ref, whh_ref, b_ref, h0_ref,
         out_ref, hlast_ref, carry_ref) = refs
    else:
        (x_ref, wxh0_ref, wxh_ref, whh_ref, b_ref,
         out_ref, hlast_ref, carry_ref) = refs
        h0_ref = None

    c = pl.program_id(1)            # time-chunk index
    l = pl.program_id(2)            # layer index
    num_chunks = pl.num_programs(1)

    Tc, Bt, Hp = out_ref.shape
    Dp = x_ref.shape[-1]
    cdt = wxh0_ref.dtype            # matmul operand dtype (f32 or bf16)

    # (Re-)initialize this layer's carried hidden state at the first chunk.
    @pl.when(c == 0)
    def _():
        if with_h0:
            carry_ref[l] = h0_ref[0].astype(jnp.float32)
        else:
            carry_ref[l] = jnp.zeros((Bt, Hp), jnp.float32)

    bias = b_ref[0]                 # (1, Hp) f32, broadcasts over rows

    # ---- Hoisted input projection: one big streaming MXU matmul ----------
    # Z = activations @ W_xh + b, written in place into the resident slab.
    @pl.when(l == 0)
    def _():
        a = x_ref[...].reshape(Tc * Bt, Dp)
        z = jnp.dot(a, wxh0_ref[...], preferred_element_type=jnp.float32)
        out_ref[...] = (z + bias).reshape(Tc, Bt, Hp)

    @pl.when(l > 0)
    def _():
        a = out_ref[...].astype(cdt).reshape(Tc * Bt, Hp)
        z = jnp.dot(a, wxh_ref[0], preferred_element_type=jnp.float32)
        out_ref[...] = (z + bias).reshape(Tc, Bt, Hp)

    # ---- Serial recurrence: one small matmul + tanh per step -------------
    w_hh = whh_ref[0]
    unroll = True if Tc <= 32 else 8

    def step(t, h):
        h_new = jnp.tanh(
            out_ref[t]
            + jnp.dot(h.astype(cdt), w_hh, preferred_element_type=jnp.float32))
        out_ref[t] = h_new          # becomes next layer's input
        return h_new

    h_fin = lax.fori_loop(0, Tc, step, carry_ref[l], unroll=unroll)
    carry_ref[l] = h_fin            # carried to the next time chunk

    @pl.when(c == num_chunks - 1)
    def _():
        hlast_ref[l] = h_fin


def stacked_rnn_forward(inputs, params, Hs=None, *, time_chunk=None,
                        batch_tile=None, compute_dtype=jnp.float32):
    """Mirrors StackedRNNScratch.forward.

    inputs: (T, B, num_inputs) float32 (seq-major, like the PyTorch loop).
    params: list of (W_xh, W_hh, b_h) per layer.
    Hs:     None, or list (per layer) of None / h0 / (h0,) with h0 (B, H).
    Returns (outputs (T, B, H), [h_last_layer_i (B, H)]).
    """
    T, B, D = inputs.shape
    H = params[0][0].shape[1]
    L = len(params)

    cdt = jnp.dtype(compute_dtype)
    csz = cdt.itemsize

    # Lane/sublane-friendly padded sizes; Dp decoupled from Hp.
    Dp = _round_up(D, 128)
    Hp = _round_up(H, 128)
    Bp = _round_up(max(B, 8), 8)

    # Time-chunk size (bounds VMEM working set; must divide T).
    Tc = T if time_chunk is None else int(time_chunk)
    if Tc <= 0 or T % Tc != 0:
        Tc = T
    # Batch tile (leading "parallel" grid axis; must divide Bp, multiple of 8).
    Bt = Bp if batch_tile is None else _round_up(int(batch_tile), 8)
    if Bt <= 0 or Bp % Bt != 0:
        Bt = Bp
    nb, nc = Bp // Bt, T // Tc

    # ---- Padded operands --------------------------------------------------
    x_pad = jnp.zeros((T, Bp, Dp), cdt).at[:, :B, :D].set(inputs.astype(cdt))

    wxh0 = jnp.zeros((Dp, Hp), cdt).at[:D, :H].set(params[0][0].astype(cdt))
    Lr = max(L - 1, 1)
    wxh_rest = jnp.zeros((Lr, Hp, Hp), cdt)
    for i in range(1, L):
        wxh_rest = wxh_rest.at[i - 1, :H, :H].set(params[i][0].astype(cdt))
    whh = jnp.zeros((L, Hp, Hp), cdt)
    bias = jnp.zeros((L, 1, Hp), jnp.float32)
    for i, (_, w_hh, b_h) in enumerate(params):
        whh = whh.at[i, :H, :H].set(w_hh.astype(cdt))
        bias = bias.at[i, 0, :H].set(b_h.astype(jnp.float32))

    with_h0 = Hs is not None and any(h is not None for h in Hs)

    operands = [x_pad, wxh0, wxh_rest, whh, bias]
    in_specs = [
        pl.BlockSpec((Tc, Bt, Dp), lambda b, c, l: (c, b, 0)),
        pl.BlockSpec((Dp, Hp), lambda b, c, l: (0, 0)),
        pl.BlockSpec((1, Hp, Hp), lambda b, c, l: (jnp.maximum(l - 1, 0), 0, 0)),
        pl.BlockSpec((1, Hp, Hp), lambda b, c, l: (l, 0, 0)),
        pl.BlockSpec((1, 1, Hp), lambda b, c, l: (l, 0, 0)),
    ]
    if with_h0:
        h0_stack = jnp.zeros((L, Bp, Hp), jnp.float32)
        for i, h in enumerate(Hs):
            if h is None:
                continue
            h_arr = h[0] if isinstance(h, (tuple, list)) else h
            h0_stack = h0_stack.at[i, :B, :H].set(h_arr.astype(jnp.float32))
        operands.append(h0_stack)
        in_specs.append(pl.BlockSpec((1, Bt, Hp), lambda b, c, l: (l, b, 0)))

    out_specs = [
        # Activation slab: constant across the layer axis -> VMEM resident,
        # written back to HBM once per (batch tile, time chunk).
        pl.BlockSpec((Tc, Bt, Hp), lambda b, c, l: (c, b, 0)),
        pl.BlockSpec((L, Bt, Hp), lambda b, c, l: (0, b, 0)),
    ]
    out_shape = (
        jax.ShapeDtypeStruct((T, Bp, Hp), jnp.float32),
        jax.ShapeDtypeStruct((L, Bp, Hp), jnp.float32),
    )

    # ---- VMEM budget (double-buffered pipelined blocks) + headroom --------
    est = (2 * Tc * Bt * Dp * csz          # x block
           + 2 * Dp * Hp * csz             # layer-0 W_xh
           + 4 * Hp * Hp * csz             # W_xh(rest) + W_hh blocks
           + 2 * Hp * 4                    # bias
           + 2 * Tc * Bt * Hp * 4          # out slab block
           + 2 * L * Bt * Hp * 4           # h_last block
           + L * Bt * Hp * 4)              # carry scratch
    if with_h0:
        est += 2 * Bt * Hp * 4
    vmem_limit = int(min(max(2 * est + (4 << 20), 32 << 20), 110 << 20))
    # TODO(synk): on v7x (64 MiB physical VMEM) pick time_chunk so `est`
    # stays well under 64 MiB for large T/B/H.

    flops = (2 * T * Bp * Dp * Hp
             + 2 * (L - 1) * T * Bp * Hp * Hp     # hoisted projections
             + 2 * L * T * Bp * Hp * Hp)          # recurrence matmuls
    cost = pl.CostEstimate(
        flops=int(flops),
        transcendentals=int(L * T * Bp * Hp),
        bytes_accessed=int(T * Bp * Dp * csz + T * Bp * Hp * 4
                           + L * Bp * Hp * 4
                           + nb * nc * (Dp * Hp + (2 * L - 1) * Hp * Hp) * csz),
    )

    kernel = functools.partial(_stacked_rnn_kernel, with_h0=with_h0)

    out_pad, h_last_pad = pl.pallas_call(
        kernel,
        grid_spec=pltpu.PrefetchScalarGridSpec(
            num_scalar_prefetch=0,
            grid=(nb, nc, L),
            in_specs=in_specs,
            out_specs=out_specs,
            scratch_shapes=[pltpu.VMEM((L, Bt, Hp), jnp.float32)],
        ),
        out_shape=out_shape,
        compiler_params=pltpu.CompilerParams(
            dimension_semantics=("parallel", "arbitrary", "arbitrary"),
            vmem_limit_bytes=vmem_limit,
        ),
        cost_estimate=cost,
    )(*operands)

    outputs = out_pad[:, :B, :H]
    new_Hs = [h_last_pad[i, :B, :H] for i in range(L)]
    return outputs, new_Hs


def init_stacked_rnn_params(key, num_inputs, num_hiddens, num_layers, sigma=0.01):
    params = []
    for i in range(num_layers):
        d_in = num_inputs if i == 0 else num_hiddens
        key, k1, k2 = jax.random.split(key, 3)
        w_xh = sigma * jax.random.normal(k1, (d_in, num_hiddens), jnp.float32)
        w_hh = sigma * jax.random.normal(k2, (num_hiddens, num_hiddens), jnp.float32)
        b_h = jnp.zeros((num_hiddens,), jnp.float32)
        params.append((w_xh, w_hh, b_h))
    return params


def _reference_forward(inputs, params, Hs=None):
    """Pure-JAX reference matching the PyTorch semantics exactly."""
    T, B, _ = inputs.shape
    outputs = inputs
    if Hs is None:
        Hs = [None] * len(params)
    new_Hs = []
    for (w_xh, w_hh, b_h), h_prev in zip(params, Hs):
        H = w_xh.shape[1]
        if h_prev is None:
            state = jnp.zeros((B, H), jnp.float32)
        else:
            state = h_prev[0] if isinstance(h_prev, (tuple, list)) else h_prev
        outs = []
        for t in range(T):
            state = jnp.tanh(outputs[t] @ w_xh + state @ w_hh + b_h)
            outs.append(state)
        outputs = jnp.stack(outs, 0)
        new_Hs.append(state)
    return outputs, new_Hs


if __name__ == "__main__":
    # Small shapes consistent with the module: seq=8, batch=2, inputs=4,
    # hidden=32, layers=2.
    T, B, num_inputs, num_hiddens, num_layers = 8, 2, 4, 32, 2

    key = jax.random.PRNGKey(0)
    key, kx = jax.random.split(key)
    inputs = jax.random.normal(kx, (T, B, num_inputs), jnp.float32)
    params = init_stacked_rnn_params(key, num_inputs, num_hiddens, num_layers,
                                     sigma=0.01)
    ref_out, ref_Hs = _reference_forward(inputs, params)

    # 1) Default path: zero init state, single time chunk, single batch tile.
    out1, Hs1 = stacked_rnn_forward(inputs, params)
    out1 = jax.block_until_ready(out1)
    Hs1 = [jax.block_until_ready(h) for h in Hs1]
    assert out1.shape == (T, B, num_hiddens)
    assert all(h.shape == (B, num_hiddens) for h in Hs1)
    assert jnp.allclose(out1, ref_out, atol=1e-5, rtol=1e-5)
    for h, rh in zip(Hs1, ref_Hs):
        assert jnp.allclose(h, rh, atol=1e-5, rtol=1e-5)

    # 2) Provided-state path + time chunking (2 chunks, carry across chunks).
    out2, Hs2 = stacked_rnn_forward(inputs, params, Hs=[(h,) for h in ref_Hs],
                                    time_chunk=4)
    out2 = jax.block_until_ready(out2)
    ref_out2, ref_Hs2 = _reference_forward(inputs, params,
                                           Hs=[(h,) for h in ref_Hs])
    assert jnp.allclose(out2, ref_out2, atol=1e-5, rtol=1e-5)
    for h, rh in zip(Hs2, ref_Hs2):
        assert jnp.allclose(h, rh, atol=1e-5, rtol=1e-5)

    # 3) Bigger batch exercising the parallel batch-tile axis + 3 layers +
    #    4 time chunks.
    B2, L2 = 16, 3
    key, kx2 = jax.random.split(key)
    inputs2 = jax.random.normal(kx2, (T, B2, num_inputs), jnp.float32)
    params2 = init_stacked_rnn_params(key, num_inputs, num_hiddens, L2,
                                      sigma=0.01)
    out3, Hs3 = stacked_rnn_forward(inputs2, params2, time_chunk=2, batch_tile=8)
    out3 = jax.block_until_ready(out3)
    ref_out3, ref_Hs3 = _reference_forward(inputs2, params2)
    assert jnp.allclose(out3, ref_out3, atol=1e-5, rtol=1e-5)
    for h, rh in zip(Hs3, ref_Hs3):
        assert jnp.allclose(h, rh, atol=1e-5, rtol=1e-5)

    # 4) bf16 MXU-operand path (loose tolerance vs. the f32 reference).
    out4, _ = stacked_rnn_forward(inputs, params, compute_dtype=jnp.bfloat16)
    out4 = jax.block_until_ready(out4)
    assert jnp.allclose(out4, ref_out, atol=1e-2, rtol=0)

    print("KERNEL_OK")
</pallas_src>

<mosaic_0001>
module attributes {stable_mosaic.version = 11 : i64} {
  func.func @_stacked_rnn_kernel(%arg0: i32, %arg1: i32, %arg2: i32, %arg3: memref<8x8x128xf32, #tpu.memory_space<vmem>>, %arg4: memref<128x128xf32, #tpu.memory_space<vmem>>, %arg5: memref<1x128x128xf32, #tpu.memory_space<vmem>>, %arg6: memref<1x128x128xf32, #tpu.memory_space<vmem>>, %arg7: memref<1x1x128xf32, #tpu.memory_space<vmem>>, %arg8: memref<8x8x128xf32, #tpu.memory_space<vmem>>, %arg9: memref<2x8x128xf32, #tpu.memory_space<vmem>>, %arg10: memref<2x8x128xf32, #tpu.memory_space<vmem>>) attributes {dimension_semantics = [#tpu.dimension_semantics<parallel>, #tpu.dimension_semantics<arbitrary>, #tpu.dimension_semantics<arbitrary>], iteration_bounds = array<i64: 1, 1, 2>, scalar_prefetch = 0 : i64, scratch_operands = 1 : i64, tpu.core_type = #tpu.core_type<tc>, window_params = [{transform_indices = @transform_0, window_bounds = array<i64: 8, 8, 128>}, {pipeline_mode = #tpu.pipeline_mode<synchronous>, transform_indices = @transform_1, window_bounds = array<i64: 128, 128>}, {transform_indices = @transform_2, window_bounds = array<i64: 1, 128, 128>}, {transform_indices = @transform_3, window_bounds = array<i64: 1, 128, 128>}, {transform_indices = @transform_4, window_bounds = array<i64: 1, 1, 128>}, {transform_indices = @transform_5, window_bounds = array<i64: 8, 8, 128>}, {transform_indices = @transform_6, window_bounds = array<i64: 2, 8, 128>}]} {
    %c0_i32 = arith.constant 0 : i32
    %0 = arith.cmpi eq, %arg1, %c0_i32 : i32
    %1 = arith.extui %0 : i1 to i32
    %c0_i32_0 = arith.constant 0 : i32
    %2 = arith.cmpi ne, %1, %c0_i32_0 : i32
    scf.if %2 {
      %cst_56 = arith.constant 0.000000e+00 : f32
      %103 = vector.broadcast %cst_56 : f32 to vector<8x128xf32>
      %104 = arith.index_cast %arg2 : i32 to index
      %c0_57 = arith.constant 0 : index
      %c0_58 = arith.constant 0 : index
      %105 = vector.load %arg10[%104, %c0_57, %c0_58] : memref<2x8x128xf32, #tpu.memory_space<vmem>>, vector<1x8x128xf32>
      %106 = vector.shape_cast %105 : vector<1x8x128xf32> to vector<8x128xf32>
      %107 = vector.shape_cast %103 : vector<8x128xf32> to vector<1x8x128xf32>
      tpu.vector_store %arg10[%104, %c0_57, %c0_58], %107 {strides = array<i32>} : memref<2x8x128xf32, #tpu.memory_space<vmem>>, vector<1x8x128xf32>,
    } else {
    }
    %c0 = arith.constant 0 : index
    %c0_1 = arith.constant 0 : index
    %c0_2 = arith.constant 0 : index
    %3 = vector.load %arg7[%c0, %c0_1, %c0_2] : memref<1x1x128xf32, #tpu.memory_space<vmem>>, vector<1x1x128xf32>
    %4 = vector.shape_cast %3 : vector<1x1x128xf32> to vector<1x128xf32>
    %c0_i32_3 = arith.constant 0 : i32
    %5 = arith.cmpi eq, %arg2, %c0_i32_3 : i32
    %6 = arith.extui %5 : i1 to i32
    %c0_i32_4 = arith.constant 0 : i32
    %7 = arith.cmpi ne, %6, %c0_i32_4 : i32
    scf.if %7 {
      %c0_56 = arith.constant 0 : index
      %c0_57 = arith.constant 0 : index
      %c0_58 = arith.constant 0 : index
      %103 = vector.load %arg3[%c0_56, %c0_57, %c0_58] : memref<8x8x128xf32, #tpu.memory_space<vmem>>, vector<8x8x128xf32>
      %104 = vector.shape_cast %103 : vector<8x8x128xf32> to vector<64x128xf32>
      %c0_59 = arith.constant 0 : index
      %c0_60 = arith.constant 0 : index
      %105 = vector.load %arg4[%c0_59, %c0_60] : memref<128x128xf32, #tpu.memory_space<vmem>>, vector<128x128xf32>
      %cst_61 = arith.constant dense<0.000000e+00> : vector<64x128xf32>
      %106 = tpu.matmul %104, %105, %cst_61 {dimension_numbers = #tpu.dot_dimension_numbers<[1], [0], [0], [1], [0, 0, 1, 1], [], []>} : vector<64x128xf32>, vector<128x128xf32>, vector<64x128xf32> -> vector<64x128xf32>
      %107 = vector.broadcast %4 : vector<1x128xf32> to vector<64x128xf32>
      %108 = arith.addf %106, %107 : vector<64x128xf32>
      %109 = vector.shape_cast %108 : vector<64x128xf32> to vector<8x8x128xf32>
      %c0_62 = arith.constant 0 : index
      %c0_63 = arith.constant 0 : index
      %c0_64 = arith.constant 0 : index
      %110 = vector.load %arg8[%c0_62, %c0_63, %c0_64] : memref<8x8x128xf32, #tpu.memory_space<vmem>>, vector<8x8x128xf32>
      tpu.vector_store %arg8[%c0_62, %c0_63, %c0_64], %109 {strides = array<i32>} : memref<8x8x128xf32, #tpu.memory_space<vmem>>, vector<8x8x128xf32>,
    } else {
    }
    %c0_i32_5 = arith.constant 0 : i32
    %8 = arith.cmpi sgt, %arg2, %c0_i32_5 : i32
    %9 = arith.extui %8 : i1 to i32
    %c0_i32_6 = arith.constant 0 : i32
    %10 = arith.cmpi ne, %9, %c0_i32_6 : i32
    scf.if %10 {
      %c0_56 = arith.constant 0 : index
      %c0_57 = arith.constant 0 : index
      %c0_58 = arith.constant 0 : index
      %103 = vector.load %arg8[%c0_56, %c0_57, %c0_58] : memref<8x8x128xf32, #tpu.memory_space<vmem>>, vector<8x8x128xf32>
      %104 = vector.shape_cast %103 : vector<8x8x128xf32> to vector<64x128xf32>
      %c0_59 = arith.constant 0 : index
      %c0_60 = arith.constant 0 : index
      %c0_61 = arith.constant 0 : index
      %105 = vector.load %arg5[%c0_59, %c0_60, %c0_61] : memref<1x128x128xf32, #tpu.memory_space<vmem>>, vector<1x128x128xf32>
      %106 = vector.shape_cast %105 : vector<1x128x128xf32> to vector<128x128xf32>
      %cst_62 = arith.constant dense<0.000000e+00> : vector<64x128xf32>
      %107 = tpu.matmul %104, %106, %cst_62 {dimension_numbers = #tpu.dot_dimension_numbers<[1], [0], [0], [1], [0, 0, 1, 1], [], []>} : vector<64x128xf32>, vector<128x128xf32>, vector<64x128xf32> -> vector<64x128xf32>
      %108 = vector.broadcast %4 : vector<1x128xf32> to vector<64x128xf32>
      %109 = arith.addf %107, %108 : vector<64x128xf32>
      %110 = vector.shape_cast %109 : vector<64x128xf32> to vector<8x8x128xf32>
      %c0_63 = arith.constant 0 : index
      %c0_64 = arith.constant 0 : index
      %c0_65 = arith.constant 0 : index
      %111 = vector.load %arg8[%c0_63, %c0_64, %c0_65] : memref<8x8x128xf32, #tpu.memory_space<vmem>>, vector<8x8x128xf32>
      tpu.vector_store %arg8[%c0_63, %c0_64, %c0_65], %110 {strides = array<i32>} : memref<8x8x128xf32, #tpu.memory_space<vmem>>, vector<8x8x128xf32>,
    } else {
    }
    %c0_7 = arith.constant 0 : index
    %c0_8 = arith.constant 0 : index
    %c0_9 = arith.constant 0 : index
    %11 = vector.load %arg6[%c0_7, %c0_8, %c0_9] : memref<1x128x128xf32, #tpu.memory_space<vmem>>, vector<1x128x128xf32>
    %12 = vector.shape_cast %11 : vector<1x128x128xf32> to vector<128x128xf32>
    %13 = arith.index_cast %arg2 : i32 to index
    %c0_10 = arith.constant 0 : index
    %c0_11 = arith.constant 0 : index
    %14 = vector.load %arg10[%13, %c0_10, %c0_11] : memref<2x8x128xf32, #tpu.memory_space<vmem>>, vector<1x8x128xf32>
    %15 = vector.shape_cast %14 : vector<1x8x128xf32> to vector<8x128xf32>
    %c0_i32_12 = arith.constant 0 : i32
    %16 = arith.index_cast %c0_i32_12 : i32 to index
    %c0_13 = arith.constant 0 : index
    %c0_14 = arith.constant 0 : index
    %17 = vector.load %arg8[%16, %c0_13, %c0_14] : memref<8x8x128xf32, #tpu.memory_space<vmem>>, vector<1x8x128xf32>
    %18 = vector.shape_cast %17 : vector<1x8x128xf32> to vector<8x128xf32>
    %cst = arith.constant dense<0.000000e+00> : vector<8x128xf32>
    %19 = tpu.matmul %15, %12, %cst {dimension_numbers = #tpu.dot_dimension_numbers<[1], [0], [0], [1], [0, 0, 1, 1], [], []>} : vector<8x128xf32>, vector<128x128xf32>, vector<8x128xf32> -> vector<8x128xf32>
    %20 = arith.addf %18, %19 : vector<8x128xf32>
    %21 = math.tanh %20 : vector<8x128xf32>
    %22 = arith.index_cast %c0_i32_12 : i32 to index
    %c0_15 = arith.constant 0 : index
    %c0_16 = arith.constant 0 : index
    %23 = vector.load %arg8[%22, %c0_15, %c0_16] : memref<8x8x128xf32, #tpu.memory_space<vmem>>, vector<1x8x128xf32>
    %24 = vector.shape_cast %23 : vector<1x8x128xf32> to vector<8x128xf32>
    %25 = vector.shape_cast %21 : vector<8x128xf32> to vector<1x8x128xf32>
    tpu.vector_store %arg8[%22, %c0_15, %c0_16], %25 {strides = array<i32>} : memref<8x8x128xf32, #tpu.memory_space<vmem>>, vector<1x8x128xf32>,
    %c1_i32 = arith.constant 1 : i32
    %26 = arith.index_cast %c1_i32 : i32 to index
    %c0_17 = arith.constant 0 : index
    %c0_18 = arith.constant 0 : index
    %27 = vector.load %arg8[%26, %c0_17, %c0_18] : memref<8x8x128xf32, #tpu.memory_space<vmem>>, vector<1x8x128xf32>
    %28 = vector.shape_cast %27 : vector<1x8x128xf32> to vector<8x128xf32>
    %cst_19 = arith.constant dense<0.000000e+00> : vector<8x128xf32>
    %29 = tpu.matmul %21, %12, %cst_19 {dimension_numbers = #tpu.dot_dimension_numbers<[1], [0], [0], [1], [0, 0, 1, 1], [], []>} : vector<8x128xf32>, vector<128x128xf32>, vector<8x128xf32> -> vector<8x128xf32>
    %30 = arith.addf %28, %29 : vector<8x128xf32>
    %31 = math.tanh %30 : vector<8x128xf32>
    %32 = arith.index_cast %c1_i32 : i32 to index
    %c0_20 = arith.constant 0 : index
    %c0_21 = arith.constant 0 : index
    %33 = vector.load %arg8[%32, %c0_20, %c0_21] : memref<8x8x128xf32, #tpu.memory_space<vmem>>, vector<1x8x128xf32>
    %34 = vector.shape_cast %33 : vector<1x8x128xf32> to vector<8x128xf32>
    %35 = vector.shape_cast %31 : vector<8x128xf32> to vector<1x8x128xf32>
    tpu.vector_store %arg8[%32, %c0_20, %c0_21], %35 {strides = array<i32>} : memref<8x8x128xf32, #tpu.memory_space<vmem>>, vector<1x8x128xf32>,
    %c2_i32 = arith.constant 2 : i32
    %36 = arith.index_cast %c2_i32 : i32 to index
    %c0_22 = arith.constant 0 : index
    %c0_23 = arith.constant 0 : index
    %37 = vector.load %arg8[%36, %c0_22, %c0_23] : memref<8x8x128xf32, #tpu.memory_space<vmem>>, vector<1x8x128xf32>
    %38 = vector.shape_cast %37 : vector<1x8x128xf32> to vector<8x128xf32>
    %cst_24 = arith.constant dense<0.000000e+00> : vector<8x128xf32>
    %39 = tpu.matmul %31, %12, %cst_24 {dimension_numbers = #tpu.dot_dimension_numbers<[1], [0], [0], [1], [0, 0, 1, 1], [], []>} : vector<8x128xf32>, vector<128x128xf32>, vector<8x128xf32> -> vector<8x128xf32>
    %40 = arith.addf %38, %39 : vector<8x128xf32>
    %41 = math.tanh %40 : vector<8x128xf32>
    %42 = arith.index_cast %c2_i32 : i32 to index
    %c0_25 = arith.constant 0 : index
    %c0_26 = arith.constant 0 : index
    %43 = vector.load %arg8[%42, %c0_25, %c0_26] : memref<8x8x128xf32, #tpu.memory_space<vmem>>, vector<1x8x128xf32>
    %44 = vector.shape_cast %43 : vector<1x8x128xf32> to vector<8x128xf32>
    %45 = vector.shape_cast %41 : vector<8x128xf32> to vector<1x8x128xf32>
    tpu.vector_store %arg8[%42, %c0_25, %c0_26], %45 {strides = array<i32>} : memref<8x8x128xf32, #tpu.memory_space<vmem>>, vector<1x8x128xf32>,
    %c3_i32 = arith.constant 3 : i32
    %46 = arith.index_cast %c3_i32 : i32 to index
    %c0_27 = arith.constant 0 : index
    %c0_28 = arith.constant 0 : index
    %47 = vector.load %arg8[%46, %c0_27, %c0_28] : memref<8x8x128xf32, #tpu.memory_space<vmem>>, vector<1x8x128xf32>
    %48 = vector.shape_cast %47 : vector<1x8x128xf32> to vector<8x128xf32>
    %cst_29 = arith.constant dense<0.000000e+00> : vector<8x128xf32>
    %49 = tpu.matmul %41, %12, %cst_29 {dimension_numbers = #tpu.dot_dimension_numbers<[1], [0], [0], [1], [0, 0, 1, 1], [], []>} : vector<8x128xf32>, vector<128x128xf32>, vector<8x128xf32> -> vector<8x128xf32>
    %50 = arith.addf %48, %49 : vector<8x128xf32>
    %51 = math.tanh %50 : vector<8x128xf32>
    %52 = arith.index_cast %c3_i32 : i32 to index
    %c0_30 = arith.constant 0 : index
    %c0_31 = arith.constant 0 : index
    %53 = vector.load %arg8[%52, %c0_30, %c0_31] : memref<8x8x128xf32, #tpu.memory_space<vmem>>, vector<1x8x128xf32>
    %54 = vector.shape_cast %53 : vector<1x8x128xf32> to vector<8x128xf32>
    %55 = vector.shape_cast %51 : vector<8x128xf32> to vector<1x8x128xf32>
    tpu.vector_store %arg8[%52, %c0_30, %c0_31], %55 {strides = array<i32>} : memref<8x8x128xf32, #tpu.memory_space<vmem>>, vector<1x8x128xf32>,
    %c4_i32 = arith.constant 4 : i32
    %56 = arith.index_cast %c4_i32 : i32 to index
    %c0_32 = arith.constant 0 : index
    %c0_33 = arith.constant 0 : index
    %57 = vector.load %arg8[%56, %c0_32, %c0_33] : memref<8x8x128xf32, #tpu.memory_space<vmem>>, vector<1x8x128xf32>
    %58 = vector.shape_cast %57 : vector<1x8x128xf32> to vector<8x128xf32>
    %cst_34 = arith.constant dense<0.000000e+00> : vector<8x128xf32>
    %59 = tpu.matmul %51, %12, %cst_34 {dimension_numbers = #tpu.dot_dimension_numbers<[1], [0], [0], [1], [0, 0, 1, 1], [], []>} : vector<8x128xf32>, vector<128x128xf32>, vector<8x128xf32> -> vector<8x128xf32>
    %60 = arith.addf %58, %59 : vector<8x128xf32>
    %61 = math.tanh %60 : vector<8x128xf32>
    %62 = arith.index_cast %c4_i32 : i32 to index
    %c0_35 = arith.constant 0 : index
    %c0_36 = arith.constant 0 : index
    %63 = vector.load %arg8[%62, %c0_35, %c0_36] : memref<8x8x128xf32, #tpu.memory_space<vmem>>, vector<1x8x128xf32>
    %64 = vector.shape_cast %63 : vector<1x8x128xf32> to vector<8x128xf32>
    %65 = vector.shape_cast %61 : vector<8x128xf32> to vector<1x8x128xf32>
    tpu.vector_store %arg8[%62, %c0_35, %c0_36], %65 {strides = array<i32>} : memref<8x8x128xf32, #tpu.memory_space<vmem>>, vector<1x8x128xf32>,
    %c5_i32 = arith.constant 5 : i32
    %66 = arith.index_cast %c5_i32 : i32 to index
    %c0_37 = arith.constant 0 : index
    %c0_38 = arith.constant 0 : index
    %67 = vector.load %arg8[%66, %c0_37, %c0_38] : memref<8x8x128xf32, #tpu.memory_space<vmem>>, vector<1x8x128xf32>
    %68 = vector.shape_cast %67 : vector<1x8x128xf32> to vector<8x128xf32>
    %cst_39 = arith.constant dense<0.000000e+00> : vector<8x128xf32>
    %69 = tpu.matmul %61, %12, %cst_39 {dimension_numbers = #tpu.dot_dimension_numbers<[1], [0], [0], [1], [0, 0, 1, 1], [], []>} : vector<8x128xf32>, vector<128x128xf32>, vector<8x128xf32> -> vector<8x128xf32>
    %70 = arith.addf %68, %69 : vector<8x128xf32>
    %71 = math.tanh %70 : vector<8x128xf32>
    %72 = arith.index_cast %c5_i32 : i32 to index
    %c0_40 = arith.constant 0 : index
    %c0_41 = arith.constant 0 : index
    %73 = vector.load %arg8[%72, %c0_40, %c0_41] : memref<8x8x128xf32, #tpu.memory_space<vmem>>, vector<1x8x128xf32>
    %74 = vector.shape_cast %73 : vector<1x8x128xf32> to vector<8x128xf32>
    %75 = vector.shape_cast %71 : vector<8x128xf32> to vector<1x8x128xf32>
    tpu.vector_store %arg8[%72, %c0_40, %c0_41], %75 {strides = array<i32>} : memref<8x8x128xf32, #tpu.memory_space<vmem>>, vector<1x8x128xf32>,
    %c6_i32 = arith.constant 6 : i32
    %76 = arith.index_cast %c6_i32 : i32 to index
    %c0_42 = arith.constant 0 : index
    %c0_43 = arith.constant 0 : index
    %77 = vector.load %arg8[%76, %c0_42, %c0_43] : memref<8x8x128xf32, #tpu.memory_space<vmem>>, vector<1x8x128xf32>
    %78 = vector.shape_cast %77 : vector<1x8x128xf32> to vector<8x128xf32>
    %cst_44 = arith.constant dense<0.000000e+00> : vector<8x128xf32>
    %79 = tpu.matmul %71, %12, %cst_44 {dimension_numbers = #tpu.dot_dimension_numbers<[1], [0], [0], [1], [0, 0, 1, 1], [], []>} : vector<8x128xf32>, vector<128x128xf32>, vector<8x128xf32> -> vector<8x128xf32>
    %80 = arith.addf %78, %79 : vector<8x128xf32>
    %81 = math.tanh %80 : vector<8x128xf32>
    %82 = arith.index_cast %c6_i32 : i32 to index
    %c0_45 = arith.constant 0 : index
    %c0_46 = arith.constant 0 : index
    %83 = vector.load %arg8[%82, %c0_45, %c0_46] : memref<8x8x128xf32, #tpu.memory_space<vmem>>, vector<1x8x128xf32>
    %84 = vector.shape_cast %83 : vector<1x8x128xf32> to vector<8x128xf32>
    %85 = vector.shape_cast %81 : vector<8x128xf32> to vector<1x8x128xf32>
    tpu.vector_store %arg8[%82, %c0_45, %c0_46], %85 {strides = array<i32>} : memref<8x8x128xf32, #tpu.memory_space<vmem>>, vector<1x8x128xf32>,
    %c7_i32 = arith.constant 7 : i32
    %86 = arith.index_cast %c7_i32 : i32 to index
    %c0_47 = arith.constant 0 : index
    %c0_48 = arith.constant 0 : index
    %87 = vector.load %arg8[%86, %c0_47, %c0_48] : memref<8x8x128xf32, #tpu.memory_space<vmem>>, vector<1x8x128xf32>
    %88 = vector.shape_cast %87 : vector<1x8x128xf32> to vector<8x128xf32>
    %cst_49 = arith.constant dense<0.000000e+00> : vector<8x128xf32>
    %89 = tpu.matmul %81, %12, %cst_49 {dimension_numbers = #tpu.dot_dimension_numbers<[1], [0], [0], [1], [0, 0, 1, 1], [], []>} : vector<8x128xf32>, vector<128x128xf32>, vector<8x128xf32> -> vector<8x128xf32>
    %90 = arith.addf %88, %89 : vector<8x128xf32>
    %91 = math.tanh %90 : vector<8x128xf32>
    %92 = arith.index_cast %c7_i32 : i32 to index
    %c0_50 = arith.constant 0 : index
    %c0_51 = arith.constant 0 : index
    %93 = vector.load %arg8[%92, %c0_50, %c0_51] : memref<8x8x128xf32, #tpu.memory_space<vmem>>, vector<1x8x128xf32>
    %94 = vector.shape_cast %93 : vector<1x8x128xf32> to vector<8x128xf32>
    %95 = vector.shape_cast %91 : vector<8x128xf32> to vector<1x8x128xf32>
    tpu.vector_store %arg8[%92, %c0_50, %c0_51], %95 {strides = array<i32>} : memref<8x8x128xf32, #tpu.memory_space<vmem>>, vector<1x8x128xf32>,
    %c8_i32 = arith.constant 8 : i32
    %96 = arith.index_cast %arg2 : i32 to index
    %c0_52 = arith.constant 0 : index
    %c0_53 = arith.constant 0 : index
    %97 = vector.load %arg10[%96, %c0_52, %c0_53] : memref<2x8x128xf32, #tpu.memory_space<vmem>>, vector<1x8x128xf32>
    %98 = vector.shape_cast %97 : vector<1x8x128xf32> to vector<8x128xf32>
    %99 = vector.shape_cast %91 : vector<8x128xf32> to vector<1x8x128xf32>
    tpu.vector_store %arg10[%96, %c0_52, %c0_53], %99 {strides = array<i32>} : memref<2x8x128xf32, #tpu.memory_space<vmem>>, vector<1x8x128xf32>,
    %c0_i32_54 = arith.constant 0 : i32
    %100 = arith.cmpi eq, %arg1, %c0_i32_54 : i32
    %101 = arith.extui %100 : i1 to i32
    %c0_i32_55 = arith.constant 0 : i32
    %102 = arith.cmpi ne, %101, %c0_i32_55 : i32
    scf.if %102 {
      %103 = arith.index_cast %arg2 : i32 to index
      %c0_56 = arith.constant 0 : index
      %c0_57 = arith.constant 0 : index
      %104 = vector.load %arg9[%103, %c0_56, %c0_57] : memref<2x8x128xf32, #tpu.memory_space<vmem>>, vector<1x8x128xf32>
      %105 = vector.shape_cast %104 : vector<1x8x128xf32> to vector<8x128xf32>
      %106 = vector.shape_cast %91 : vector<8x128xf32> to vector<1x8x128xf32>
      tpu.vector_store %arg9[%103, %c0_56, %c0_57], %106 {strides = array<i32>} : memref<2x8x128xf32, #tpu.memory_space<vmem>>, vector<1x8x128xf32>,
    } else {
    }
    return
  }
  func.func @transform_0(%arg0: i32, %arg1: i32, %arg2: i32) -> (i32, i32, i32) {
    %c0_i32 = arith.constant 0 : i32
    %c0_i32_0 = arith.constant 0 : i32
    return %arg1, %arg0, %c0_i32 : i32, i32, i32
  }
  func.func @transform_1(%arg0: i32, %arg1: i32, %arg2: i32) -> (i32, i32) {
    %c0_i32 = arith.constant 0 : i32
    %c0_i32_0 = arith.constant 0 : i32
    %c0_i32_1 = arith.constant 0 : i32
    return %c0_i32, %c0_i32_0 : i32, i32
  }
  func.func @transform_2(%arg0: i32, %arg1: i32, %arg2: i32) -> (i32, i32, i32) {
    %c1_i32 = arith.constant 1 : i32
    %0 = arith.subi %arg2, %c1_i32 : i32
    %c0_i32 = arith.constant 0 : i32
    %1 = arith.maxsi %0, %c0_i32 : i32
    %c0_i32_0 = arith.constant 0 : i32
    %c0_i32_1 = arith.constant 0 : i32
    %c0_i32_2 = arith.constant 0 : i32
    return %1, %c0_i32_0, %c0_i32_1 : i32, i32, i32
  }
  func.func @transform_3(%arg0: i32, %arg1: i32, %arg2: i32) -> (i32, i32, i32) {
    %c0_i32 = arith.constant 0 : i32
    %c0_i32_0 = arith.constant 0 : i32
    %c0_i32_1 = arith.constant 0 : i32
    return %arg2, %c0_i32, %c0_i32_0 : i32, i32, i32
  }
  func.func @transform_4(%arg0: i32, %arg1: i32, %arg2: i32) -> (i32, i32, i32) {
    %c0_i32 = arith.constant 0 : i32
    %c0_i32_0 = arith.constant 0 : i32
    %c0_i32_1 = arith.constant 0 : i32
    return %arg2, %c0_i32, %c0_i32_0 : i32, i32, i32
  }
  func.func @transform_5(%arg0: i32, %arg1: i32, %arg2: i32) -> (i32, i32, i32) {
    %c0_i32 = arith.constant 0 : i32
    %c0_i32_0 = arith.constant 0 : i32
    return %arg1, %arg0, %c0_i32 : i32, i32, i32
  }
  func.func @transform_6(%arg0: i32, %arg1: i32, %arg2: i32) -> (i32, i32, i32) {
    %c0_i32 = arith.constant 0 : i32
    %c0_i32_0 = arith.constant 0 : i32
    %c0_i32_1 = arith.constant 0 : i32
    return %c0_i32, %arg0, %c0_i32_0 : i32, i32, i32
  }
}

</mosaic_0001>

<bundles_post_ra>
// kernel: tpu_custom_call.1
= control target key start
LH: loop header
LB: loop body
LE: loop exit
PB: predicated region body
PF: predicated region fallthrough
CT: control target
= control target key end

     0   :  { %s3331_s0 = inlined_call_operand.hbm [shape: f32[8,8,128], index: 0, kind: input, shape index: {}]   ;;  %s3332_s1 = inlined_call_operand.hbm [shape: f32[128,128], index: 1, kind: input, shape index: {}]   ;;  %s3333_s2 = inlined_call_operand.hbm [shape: f32[1,128,128], index: 2, kind: input, shape index: {}]   ;;  %s3334_s3 = inlined_call_operand.hbm [shape: f32[2,128,128], index: 3, kind: input, shape index: {}]   ;;  %s3335_s4 = inlined_call_operand.vmem [shape: f32[2,1,128], index: 4, kind: input, shape index: {}]   ;;  %s3336_s5 = inlined_call_operand.hbm [shape: f32[8,8,128], index: 5, kind: output, shape index: {0}]   ;;  %s3337_s6 = inlined_call_operand.hbm [shape: f32[2,8,128], index: 6, kind: output, shape index: {1}]  }
   0x1   :  { %3355 = sst [smem:[#allocation20_spill]] %s3331_s0 }
   0x2   :  { %3356 = sst [smem:[#allocation21_spill]] %s3336_s5 }
   0x3   :  { %3357 = sst [smem:[#allocation22_spill]] %s3337_s6 }
   0x4   :  { %12 = vsyncpa [#allocation4], 0 }
   0x5   :  { %13 = vsyncpa [#allocation7], 0 }
   0x6   :  { %14 = vsyncpa [#allocation5], 0 }
   0x7   :  { %15 = vsyncpa [#allocation12], 0  ;;  %s2804_s21 = smov 0   ;;  %s2806_s22 = smov 0  }
   0x8   :  { %s2808_s23 = smov 0   ;;  %s2810_s24 = smov 0  }
   0x9   :  { %s2812_s25 = smov 0   ;;  %s2814_s26 = smov 0  }
   0xa   :  { %s2816_s27 = smov 0   ;;  %s2818_s28 = smov 0  }
   0xb LB: > { %s2841_s29 = sadd.s32 4294967295, %s2754_s28   ;;  %p115_p0 = scmp.ne.s32.totalorder %s2742_s25, %s2738_s24  ;;  %s2754_s28 = sphi %s2818_s28, %s21_s28   ;;  %s2750_s27 = sphi %s2816_s27, %s3391_s27   ;;  %s2746_s26 = sphi %s2814_s26, %s3390_s26   ;;  %s2742_s25 = sphi %s2812_s25, %s3321_s25   ;;  %s2738_s24 = sphi %s2810_s24, %s3389_s24   ;;  %s2734_s23 = sphi %s2808_s23, %s3388_s23   ;;  %s2730_s22 = sphi %s2806_s22, %s3387_s22   ;;  %s2726_s21 = sphi %s2804_s21, %s3386_s21  }
   0xc   : > { %p3338_p1 = scmp.eq.s32.totalorder %s2841_s29, 0  ;;  %p141_p2 = scmp.ne.s32.totalorder %s2730_s22, %s2726_s21 }
   0xd   : > { %p1485_p3 = scmp.ge.s32.totalorder %s2754_s28, 1  ;;  %p232_p4 = scmp.lt.s32.totalorder %s2754_s28, 3 }
   0xe   : > { %p2850_p5 = por %p3338_p1, %p115_p0  ;;  %p2856_p6 = por %p141_p2, %p3338_p1 }
   0xf   : > { %p2860_p7 = pnand %p1485_p3, %p232_p4  ;;  %s2756_s9 = smov [#allocation3]  }
  0x10   : > { %s3358_s30 = scalar_select %p2850_p5, 1, 0 }
  0x11   : > { %s3359_s7 = scalar_select %p2856_p6, 1, 0 }
  0x12   : > { %s3360_s8 = scalar_select %p2860_p7, 1, 0 }
  0x13   : > { %p2373_p8 = pneg %p2860_p7  ;;  %s248_s10 = sshll.u32 %s2756_s9, 4  ;;  %s249_s10 = int_to_ptr.vmem [resolvable:$true] %s248_s10 }
  0x14   : > { %s3362_s0 = sld [smem:[#allocation20_spill]] }
  0x15   : > { %p2868_p9 = pnand %p2373_p8, %p3338_p1 }
  0x17   : > { %s3361_s11 = scalar_select %p2868_p9, 1, 0 }
  0x18   : > { %p3348_p11 = pneg %p2868_p9 }
  0x1a   : > { %s2495_s14 = scalar_lea.hbm %s3362_s0, 1024 }
  0x1b   : > { %p2496_p10 = scmp.ne.s32.totalorder %s3362_s0, %s2495_s14  ;;  %p2502_p0 = scmp.lt.u32.totalorder %s2495_s14, %s3362_s0 }
  0x1d   : > { %p2498_p12 = pnand %p3348_p11, %p2496_p10 }
  0x1f   : > { %p2499_p13 = pneg %p2498_p12 }
  0x21   : > { %p2504_p2 = pnand %p2502_p0, %p2499_p13 }
  0x23   : > { %2507 = shalt.err (!%p2504_p2)
}
  0x24   : > { %s2508_s19 = scalar_lea.vmem %s249_s10, 1024  ;;  %p2516_p1 = scmp.lt.s32.totalorder %s249_s10, %s249_s10 }
  0x25   : > { %p2509_p3 = scmp.ne.s32.totalorder %s249_s10, %s2508_s19  ;;  %p2517_p6 = scmp.lt.s32.totalorder %s2508_s19, %s2508_s19 }
  0x27   : > { %p2511_p4 = pnand %p2509_p3, %p3348_p11  ;;  %p2518_p5 = por %p2517_p6, %p2516_p1 }
  0x29   : > { %p2512_p8 = pneg %p2511_p4 }
  0x2b   : > { %p2519_p7 = pnand %p2518_p5, %p2512_p8 }
  0x2d   : > { %2522 = shalt.err (!%p2519_p7)
}
  0x2e   : > { %s3342_s20 = smov 128   ;;  %s3344_s21 = smov 8  }
  0x2f   : > { %2376 = dma.hbm_to_vmem [thread:$0]  (!%p2868_p9), %s3362_s0, 1024, %s249_s10, [#allocation4], %s3342_s20, %s3342_s20, %s3344_s21  }
  0x30   : > { %s33_s12 = sadd.s32 1, %s2750_s27  ;;  %p2723_p5 = scmp.ne.s32.totalorder %s2742_s25, 0 }
  0x31   : > { %p34_p1 = scmp.ge.s32.totalorder %s33_s12, 2  ;;  %p3347_p6 = scmp.eq.s32.totalorder %s2754_s28, 0 }
  0x32   : > { %p3346_p7 = scmp.lt.s32.totalorder %s2754_s28, 2  ;;  %s275_s15 = sand.u32 1, %s2754_s28  }
  0x33   : > { %s3393_s12 = smov (%p34_p1, %s33_s12), 0  ;;  %p111_p10 = por %p2723_p5, %p3347_p6 }
  0x34   : > { %3363 = sst [smem:[#allocation19_spill]] %s3393_s12  ;;  %s125_s13 = ssub.s32 %s2750_s27, %s3393_s12 }
  0x35   : > { %p2907_p12 = scmp.eq.s32.totalorder %s125_s13, 0  ;;  %p2914_p13 = pnand %p3346_p7, %p111_p10 }
  0x36   : > { %s2759_s10 = smov [#allocation8]   ;;  %s2918_s18 = scalar_lea.sflag [#allocation4], %s275_s15 }
  0x37   : > { %s3364_s14 = scalar_select %p2907_p12, 1, 0 }
  0x38   : > { %s3365_s16 = scalar_select %p2914_p13, 1, 0 }
  0x39   : > { %s289_s17 = sshll.u32 %s2759_s10, 4  ;;  %s2523_s9 = scalar_lea.hbm %s3333_s2, 2048  ;;  %s290_s17 = int_to_ptr.vmem [resolvable:$true] %s289_s17 }
  0x3a   : > { %p2524_p0 = scmp.ne.s32.totalorder %s3333_s2, %s2523_s9  ;;  %p2525_p2 = pneg %p2914_p13 }
  0x3b   : > { %p2530_p8 = scmp.lt.u32.totalorder %s2523_s9, %s2523_s9  ;;  %p2532_p1 = scmp.lt.u32.totalorder %s2523_s9, %s3333_s2 }
  0x3c   : > { %p2526_p3 = pnand %p2525_p2, %p2524_p0 }
  0x3d   : > { %p2533_p5 = por %p2532_p1, %p2530_p8 }
  0x3e   : > { %p2527_p4 = pneg %p2526_p3 }
  0x40   : > { %p2534_p10 = pnand %p2533_p5, %p2527_p4 }
  0x42   : > { %2537 = shalt.err (!%p2534_p10)
}
  0x43   : > { %s2538_s15 = scalar_lea.vmem %s290_s17, 2048  ;;  %s2545_s10 = scalar_lea.vmem %s290_s17, 4096 }
  0x44   : > { %p2539_p7 = scmp.ne.s32.totalorder %s290_s17, %s2538_s15  ;;  %p2546_p12 = scmp.lt.s32.totalorder %s290_s17, %s290_s17 }
  0x45   : > { %p2547_p9 = scmp.lt.s32.totalorder %s2545_s10, %s2538_s15 }
  0x46   : > { %p2541_p6 = pnand %p2539_p7, %p2525_p2 }
  0x47   : > { %p2548_p13 = por %p2547_p9, %p2546_p12 }
  0x48   : > { %p2542_p11 = pneg %p2541_p6 }
  0x4a   : > { %p2549_p0 = pnand %p2548_p13, %p2542_p11 }
  0x4c   : > { %2552 = shalt.err (!%p2549_p0)
}
  0x4d   : > { %p3366_p3 = scmp.ne.s32.totalorder %s3365_s16, 0  ;;  %s3367_s20 = smov 8  }
  0x4e   : > { %s3368_s19 = smov 128   ;;  %s2760_s24 = smov [#allocation6]  }
  0x4f   : > { %2383 = dma.hbm_to_vmem [thread:$0]  (!%p3366_p3), %s3333_s2, 2048, %s290_s17, %s2918_s18, %s3368_s19, %s3368_s19, %s3367_s20  }
  0x50   : > { %s261_s9 = sshll.u32 %s2760_s24, 4  ;;  %s2553_s15 = scalar_lea.hbm %s3332_s1, 2048  ;;  %s262_s9 = int_to_ptr.vmem [resolvable:$true] %s261_s9 }
  0x51   : > { %p2554_p9 = scmp.ne.s32.totalorder %s3332_s1, %s2553_s15  ;;  %p3369_p11 = scmp.ne.s32.totalorder %s3361_s11, 0 }
  0x52   : > { %p2560_p13 = scmp.lt.u32.totalorder %s2553_s15, %s3332_s1 }
  0x53   : > { %p3370_p6 = pneg %p3369_p11 }
  0x55   : > { %p2556_p7 = pnand %p2554_p9, %p3370_p6 }
  0x57   : > { %p2557_p12 = pneg %p2556_p7 }
  0x59   : > { %p2562_p2 = pnand %p2560_p13, %p2557_p12 }
  0x5b   : > { %2565 = shalt.err (!%p2562_p2)
}
  0x5c   : > { %s2566_s17 = scalar_lea.vmem %s262_s9, 2048  ;;  %p3371_p8 = pmov %p3370_p6 }
  0x5d   : > { %p2567_p4 = scmp.ne.s32.totalorder %s262_s9, %s2566_s17  ;;  %p2574_p10 = scmp.lt.s32.totalorder %s262_s9, %s262_s9 }
  0x5e   : > { %p2575_p0 = scmp.lt.s32.totalorder %s2566_s17, %s2566_s17 }
  0x5f   : > { %p2569_p1 = pnand %p2567_p4, %p3371_p8 }
  0x60   : > { %p2576_p3 = por %p2575_p0, %p2574_p10 }
  0x61   : > { %p2570_p5 = pneg %p2569_p1 }
  0x63   : > { %p2577_p6 = pnand %p2576_p3, %p2570_p5 }
  0x65   : > { %2580 = shalt.err (!%p2577_p6)
}
  0x66   : > { %2379 = dma.hbm_to_vmem [thread:$0]  (!%p3369_p11), %s3332_s1, 2048, %s262_s9, [#allocation7], %s3368_s19, %s3368_s19, %s3367_s20  }
  0x67   : > { %s128_s12 = sadd.s32 1, %s2734_s23  ;;  %p135_p9 = scmp.ne.s32.totalorder %s2734_s23, %s2730_s22 }
  0x68   : > { %p3372_p7 = scmp.ne.s32.totalorder %s3364_s14, 0  ;;  %p3373_p12 = scmp.eq.s32.totalorder %s2754_s28, 0 }
  0x69   : > { %s301_s0 = sand.u32 1, %s2734_s23   ;;  %s1512_s24 = sshll.u32 %s2750_s27, 11 }
  0x6a   : > { %s2969_s11 = scalar_select %p3372_p7, %s2734_s23, %s128_s12  }
  0x6b   : > { %p137_p13 = por %p135_p9, %p3373_p12  ;;  %s1493_s21 = sshll.u32 %s301_s0, 7 }
  0x6c   : > { %s2978_s10 = scalar_lea.hbm %s3334_s3, %s1512_s24  ;;  %s303_s9 = scalar_lea.vmem [#allocation9], %s1493_s21 }
  0x6d   : > { %s310_s16 = sshll.u32 %s303_s9, 4  ;;  %p3374_p11 = scmp.lt.s32.totalorder %s2754_s28, 2  ;;  %s2986_s16 = int_to_ptr.vmem [resolvable:$true] %s310_s16 }
  0x6e   : > { %s2581_s17 = scalar_lea.hbm %s2978_s10, 2048  ;;  %s2586_s12 = scalar_lea.hbm %s3334_s3, 4096 }
  0x6f   : > { %p2982_p2 = pnand %p3374_p11, %p137_p13  ;;  %p2582_p4 = scmp.ne.s32.totalorder %s2978_s10, %s2581_s17 }
  0x70   : > { %p2587_p10 = scmp.lt.u32.totalorder %s2978_s10, %s3334_s3  ;;  %p2588_p0 = scmp.lt.u32.totalorder %s2586_s12, %s2581_s17 }
  0x71   : > { %p2583_p8 = pneg %p2982_p2  ;;  %p2590_p6 = scmp.lt.u32.totalorder %s2581_s17, %s2978_s10 }
  0x72   : > { %p2589_p3 = por %p2588_p0, %p2587_p10 }
  0x73   : > { %p2584_p1 = pnand %p2583_p8, %p2582_p4 }
  0x74   : > { %p2591_p9 = por %p2590_p6, %p2589_p3 }
  0x75   : > { %p2585_p5 = pneg %p2584_p1 }
  0x77   : > { %p2592_p7 = pnand %p2591_p9, %p2585_p5 }
  0x79   : > { %2595 = shalt.err (!%p2592_p7)
}
  0x7a   : > { %s2596_s24 = scalar_lea.vmem %s2986_s16, 2048  ;;  %s2761_s13 = smov [#allocation9]  }
  0x7b   : > { %p2597_p12 = scmp.ne.s32.totalorder %s2986_s16, %s2596_s24  ;;  %s2601_s15 = sshll.u32 %s2761_s13, 4  ;;  %s2602_s15 = int_to_ptr.vmem [resolvable:$false] %s2601_s15 }
  0x7c   : > { %s2603_s9 = scalar_lea.vmem %s2602_s15, 4096  ;;  %p2604_p4 = scmp.lt.s32.totalorder %s2986_s16, %s2602_s15 }
  0x7d   : > { %p2599_p13 = pnand %p2597_p12, %p2583_p8  ;;  %p2605_p1 = scmp.lt.s32.totalorder %s2603_s9, %s2596_s24 }
  0x7f   : > { %p2600_p11 = pneg %p2599_p13  ;;  %p2606_p10 = por %p2605_p1, %p2604_p4 }
  0x81   : > { %p2607_p0 = pnand %p2606_p10, %p2600_p11 }
  0x83   : > { %2610 = shalt.err (!%p2607_p0)
}
  0x84   : > { %2386 = dma.hbm_to_vmem [thread:$0]  (!%p2982_p2), %s2978_s10, 2048, %s2986_s16, %s2918_s18, %s3368_s19, %s3368_s19, %s3367_s20  }
  0x85   : > { %p3376_p8 = scmp.ne.s32.totalorder %s3360_s8, 0 }
  0x86   : > { %p3377_p5 = scmp.eq.s32.totalorder (!%p3376_p8), %s2841_s29, 0 }
  0x87   : > { %328 = sbr.rel (%p3376_p8) target bundleno = 2556 (0x9fc), region = 40 }
  0x8e   : > { %2700 = dma.done.wait (%p3377_p5), [#allocation4], 1024   ;;  %p3378_p3 = pmov %p3377_p5 }
  0x90   : > { %2702 = vsyncadd (%p3378_p3), [#allocation4], 4294966272  ;;  %p3379_p6 = pmov %p3378_p3 }
  0x91   : > { %p3380_p9 = pmov %p3378_p3 }
  0x92   : > { %2704 = dma.done.wait (%p3379_p6), [#allocation7], 2048  }
  0x93   : > { %2706 = vsyncadd (%p3380_p9), [#allocation7], 4294965248  ;;  %s338_s14 = sand.u32 1, %s2841_s29   ;;  %s340_s18 = sand.u32 1, %s2742_s25  }
  0x94   : > { %s1499_s20 = sshll.u32 %s340_s18, 7  ;;  %s339_s8 = scalar_lea.sflag [#allocation4], %s338_s14 }
  0x95   : > { %s3029_s19 = scalar_lea.vmem [#allocation8], %s1499_s20  ;;  %p3381_p2 = scmp.ne.s32.totalorder %s3358_s30, 0 }
  0x97   : > { %2708 = dma.done.wait (%p3381_p2), %s339_s8, 2048  }
  0x98   : > { %2710 = vsyncadd (%p3381_p2), %s339_s8, 4294965248  ;;  %s349_s10 = sand.u32 1, %s2730_s22   ;;  %p3382_p7 = scmp.ne.s32.totalorder %s3359_s7, 0 }
  0x99   : > { %s1500_s16 = sshll.u32 %s349_s10, 7 }
  0x9a   : > { %s3036_s17 = scalar_lea.vmem [#allocation9], %s1500_s16 }
  0x9b   : > { %2712 = dma.done.wait (%p3382_p7), %s339_s8, 2048  }
  0x9c   : > { %2714 = vsyncadd (%p3382_p7), %s339_s8, 4294965248  ;;  %p387_p12 = scmp.lt.s32.totalorder %s2746_s26, 1  ;;  %s1501_s5 = sshll.u32 %s2746_s26, 3  ;;  %v2762_v0 = vmov 0.0  }
  0x9d   : > { %s3047_s30 = scalar_lea.vmem [#allocation2], %s1501_s5  ;;  %p1502_p13 = scmp.ne.s32.totalorder %s2746_s26, 0 }
  0x9e   : > { %s388_s6 = scalar_select %p387_p12, %s2746_s26, 1  ;;  %397 = vst [vmem:[%s3047_s30] sm:$0xff] %v2762_v0 }
  0x9f   : > { %402 = sbr.rel (%p1502_p13) target bundleno = 414 (0x19e), region = 64  ;;  %v411_v2 = vld [vmem:[#allocation6] sm:$0xff] (!%p1502_p13)  ;;  %v412_v3 = vld [vmem:[#allocation6 + $0x8] sm:$0xff] (!%p1502_p13)  ;;  %v413_v4 = vld [vmem:[#allocation6 + $0x10] sm:$0xff] (!%p1502_p13)  ;;  %v428_v34 = vlaneseq (!%p1502_p13) }
  0xa0   : > { %s389_s21 = scalar_lea.vmem %s3335_s4, %s388_s6  ;;  %v2065_v5 = vpack.c.bf16 (!%p1502_p13), %v412_v3, %v411_v2  ;;  %v414_v6 = vld [vmem:[#allocation6 + $0x18] sm:$0xff] (!%p1502_p13)  ;;  %v415_v8 = vld [vmem:[#allocation6 + $0x20] sm:$0xff] (!%p1502_p13)  ;;  %v416_v9 = vld [vmem:[#allocation6 + $0x28] sm:$0xff] (!%p1502_p13) }
  0xa1   : > { %v3054_v1 = vld [vmem:[%s389_s21] sm:$0x1]  ;;  %v2069_v7 = vpack.c.bf16 (!%p1502_p13), %v414_v6, %v413_v4  ;;  %v2073_v10 = vpack.c.bf16 (!%p1502_p13), %v416_v9, %v415_v8  ;;  %v403_v11 = vld [vmem:[#allocation3] sm:$0xff] (!%p1502_p13)  ;;  %v418_v14 = vld [vmem:[#allocation6 + $0x38] sm:$0xff] (!%p1502_p13)  ;;  %v429_v35 = vshrl.u32 (!%p1502_p13), %v428_v34, 7 }
  0xa2   : > { %2066 = vmatprep.subr.bf16.mxu0 (!%p1502_p13), %v2065_v5  ;;  %2321 = vmatprep.subr.bf16.mxu1 (!%p1502_p13), %v2065_v5  ;;  %v407_v12 = vld [vmem:[#allocation3 + $0x20] sm:$0xff] (!%p1502_p13)  ;;  %v417_v13 = vld [vmem:[#allocation6 + $0x30] sm:$0xff] (!%p1502_p13)  ;;  %v420_v17 = vld [vmem:[#allocation6 + $0x48] sm:$0xff] (!%p1502_p13) }
  0xa3   : > { %2068 = vmatpush3.bf16.msra.mxu0 (!%p1502_p13), %v2065_v5  ;;  %2329 = vmatpush3.bf16.msra.mxu1 (!%p1502_p13), %v2065_v5  ;;  %v2077_v15 = vpack.c.bf16 (!%p1502_p13), %v418_v14, %v417_v13  ;;  %v419_v16 = vld [vmem:[#allocation6 + $0x40] sm:$0xff] (!%p1502_p13)  ;;  %v421_v19 = vld [vmem:[#allocation6 + $0x50] sm:$0xff] (!%p1502_p13)  ;;  %v422_v20 = vld [vmem:[#allocation6 + $0x58] sm:$0xff] (!%p1502_p13)  ;;  %v430_v36 = vsub.s32 (!%p1502_p13), 0, %v429_v35 }
  0xa4   : > { %2070 = vmatprep.subr.bf16.mxu0 (!%p1502_p13), %v2069_v7  ;;  %2322 = vmatprep.subr.bf16.mxu1 (!%p1502_p13), %v2069_v7  ;;  %v2081_v18 = vpack.c.bf16 (!%p1502_p13), %v420_v17, %v419_v16  ;;  %v2085_v21 = vpack.c.bf16 (!%p1502_p13), %v422_v20, %v421_v19  ;;  %v423_v22 = vld [vmem:[#allocation6 + $0x60] sm:$0xff] (!%p1502_p13)  ;;  %v424_v23 = vld [vmem:[#allocation6 + $0x68] sm:$0xff] (!%p1502_p13)  ;;  %v425_v25 = vld [vmem:[#allocation6 + $0x70] sm:$0xff] (!%p1502_p13) }
  0xa5   : > { %1729 = vmatprep.mubr.f32.mxu0 (!%p1502_p13), %v403_v11  ;;  %1735 = vmatprep.mubr.f32.mxu1 (!%p1502_p13), %v407_v12  ;;  %v2089_v24 = vpack.c.bf16 (!%p1502_p13), %v424_v23, %v423_v22  ;;  %v426_v26 = vld [vmem:[#allocation6 + $0x78] sm:$0xff] (!%p1502_p13)  ;;  %v404_v28 = vld [vmem:[#allocation3 + $0x8] sm:$0xff] (!%p1502_p13)  ;;  %v405_v30 = vld [vmem:[#allocation3 + $0x10] sm:$0xff] (!%p1502_p13)  ;;  %v431_v37 = vrot.slane (!%p1502_p13), %v3054_v1, %v430_v36 }
  0xa6   : > { %v2093_v27 = vpack.c.bf16 %v426_v26, %v425_v25  ;;  %v408_v29 = vld [vmem:[#allocation3 + $0x28] sm:$0xff]  ;;  %v409_v31 = vld [vmem:[#allocation3 + $0x30] sm:$0xff]  ;;  %v406_v32 = vld [vmem:[#allocation3 + $0x18] sm:$0xff] }
  0xa7   : > { %2072 = vmatpush3.bf16.msra.mxu0 %v2069_v7  ;;  %2330 = vmatpush3.bf16.msra.mxu1 %v2069_v7  ;;  %v410_v33 = vld [vmem:[#allocation3 + $0x38] sm:$0xff] }
  0xa8   : > { %2074 = vmatprep.subr.bf16.mxu0 %v2073_v10  ;;  %2323 = vmatprep.subr.bf16.mxu1 %v2073_v10 }
  0xab   : > { %2076 = vmatpush3.bf16.msra.mxu0 %v2073_v10  ;;  %2331 = vmatpush3.bf16.msra.mxu1 %v2073_v10 }
  0xac   : > { %2078 = vmatprep.subr.bf16.mxu0 %v2077_v15  ;;  %2324 = vmatprep.subr.bf16.mxu1 %v2077_v15 }
  0xaf   : > { %2080 = vmatpush3.bf16.msra.mxu0 %v2077_v15  ;;  %2332 = vmatpush3.bf16.msra.mxu1 %v2077_v15 }
  0xb0   : > { %2082 = vmatprep.subr.bf16.mxu0 %v2081_v18  ;;  %2325 = vmatprep.subr.bf16.mxu1 %v2081_v18 }
  0xb3   : > { %2084 = vmatpush3.bf16.msra.mxu0 %v2081_v18  ;;  %2333 = vmatpush3.bf16.msra.mxu1 %v2081_v18 }
  0xb4   : > { %2086 = vmatprep.subr.bf16.mxu0 %v2085_v21  ;;  %2326 = vmatprep.subr.bf16.mxu1 %v2085_v21 }
  0xb7   : > { %2088 = vmatpush3.bf16.msra.mxu0 %v2085_v21  ;;  %2334 = vmatpush3.bf16.msra.mxu1 %v2085_v21 }
  0xb8   : > { %2090 = vmatprep.subr.bf16.mxu0 %v2089_v24  ;;  %2327 = vmatprep.subr.bf16.mxu1 %v2089_v24 }
  0xbb   : > { %2092 = vmatpush3.bf16.msra.mxu0 %v2089_v24  ;;  %2335 = vmatpush3.bf16.msra.mxu1 %v2089_v24 }
  0xbc   : > { %2094 = vmatprep.subr.bf16.mxu0 %v2093_v27  ;;  %2328 = vmatprep.subr.bf16.mxu1 %v2093_v27 }
  0xbf   : > { %2096 = vmatpush3.bf16.msra.mxu0 %v2093_v27  ;;  %2336 = vmatpush3.bf16.msra.mxu1 %v2093_v27 }
  0xc2   : > { %1730 = vmatmul.mubr.f32.vlgmr.msra.gmra.mrb[0].mxu0 %v404_v28  ;;  %1736 = vmatmul.mubr.f32.vlgmr.msra.gmra.mrb[0].mxu1 %v408_v29 }
  0xc3   : > { %1732 = vmatprep.mubr.f32.mxu0 %v405_v30  ;;  %1738 = vmatprep.mubr.f32.mxu1 %v409_v31 }
  0xc6   : > { %1733 = vmatmul.mubr.f32.gmra.mrb[2].mxu0 %v406_v32  ;;  %1739 = vmatmul.mubr.f32.gmra.mrb[2].mxu1 %v410_v33 }
 0x195   : > { %v1731_v38 = vpop.f32.mrb[0].mxu0  ;;  %v1737_v39 = vpop.f32.mrb[0].mxu1 }
 0x196   : > { %v505_v40 = vadd.f32 %v1731_v38, %v431_v37  ;;  %v525_v41 = vadd.f32 %v1737_v39, %v431_v37  ;;  %v499_v42 = vpop.f32.mrb[1].mxu0  ;;  %v519_v43 = vpop.f32.mrb[1].mxu1 }
 0x197   : > { %v500_v44 = vadd.f32 %v499_v42, %v431_v37  ;;  %v520_v45 = vadd.f32 %v519_v43, %v431_v37 }
 0x198   : > { %539 = vst [vmem:[#allocation10 + $0x8] sm:$0xff] %v505_v40  ;;  %543 = vst [vmem:[#allocation10 + $0x28] sm:$0xff] %v525_v41 }
 0x199   : > { %538 = vst [vmem:[#allocation10] sm:$0xff] %v500_v44  ;;  %542 = vst [vmem:[#allocation10 + $0x20] sm:$0xff] %v520_v45  ;;  %v1734_v46 = vpop.f32.mrb[2].mxu0  ;;  %v1740_v47 = vpop.f32.mrb[2].mxu1 }
 0x19a   : > { %v515_v48 = vadd.f32 %v1734_v46, %v431_v37  ;;  %v535_v49 = vadd.f32 %v1740_v47, %v431_v37  ;;  %v509_v50 = vpop.f32.mrb[3].mxu0  ;;  %v529_v51 = vpop.f32.mrb[3].mxu1 }
 0x19b   : > { %v510_v52 = vadd.f32 %v509_v50, %v431_v37  ;;  %v530_v53 = vadd.f32 %v529_v51, %v431_v37 }
 0x19c   : > { %541 = vst [vmem:[#allocation10 + $0x18] sm:$0xff] %v515_v48  ;;  %545 = vst [vmem:[#allocation10 + $0x38] sm:$0xff] %v535_v49 }
 0x19d   : > { %540 = vst [vmem:[#allocation10 + $0x10] sm:$0xff] %v510_v52  ;;  %544 = vst [vmem:[#allocation10 + $0x30] sm:$0xff] %v530_v53 }
 0x19e PF: > { %p1503_p11 = scmp.le.s32.totalorder %s2746_s26, 0 }
 0x19f   : > { %v558_v54 = vld [vmem:[%s3029_s19] sm:$0xff] (!%p1503_p11)  ;;  %v559_v55 = vld [vmem:[%s3029_s19 + $0x8] sm:$0xff] (!%p1503_p11)  ;;  %v560_v56 = vld [vmem:[%s3029_s19 + $0x10] sm:$0xff] (!%p1503_p11)  ;;  %v575_v24 = vlaneseq (!%p1503_p11) }
 0x1a0   : > { %549 = sbr.rel (%p1503_p11) target bundleno = 670 (0x29e), region = 68  ;;  %v2097_v57 = vpack.c.bf16 (!%p1503_p11), %v559_v55, %v558_v54  ;;  %v561_v58 = vld [vmem:[%s3029_s19 + $0x18] sm:$0xff] (!%p1503_p11)  ;;  %v562_v60 = vld [vmem:[%s3029_s19 + $0x20] sm:$0xff] (!%p1503_p11)  ;;  %v563_v61 = vld [vmem:[%s3029_s19 + $0x28] sm:$0xff] (!%p1503_p11) }
 0x1a1   : > { %v2101_v59 = vpack.c.bf16 (!%p1503_p11), %v561_v58, %v560_v56  ;;  %v2105_v62 = vpack.c.bf16 (!%p1503_p11), %v563_v61, %v562_v60  ;;  %v550_v63 = vld [vmem:[#allocation10] sm:$0xff] (!%p1503_p11)  ;;  %v564_v3 = vld [vmem:[%s3029_s19 + $0x30] sm:$0xff] (!%p1503_p11)  ;;  %v565_v4 = vld [vmem:[%s3029_s19 + $0x38] sm:$0xff] (!%p1503_p11)  ;;  %v576_v25 = vshrl.u32 (!%p1503_p11), %v575_v24, 7 }
 0x1a2   : > { %2098 = vmatprep.subr.bf16.mxu0 (!%p1503_p11), %v2097_v57  ;;  %2337 = vmatprep.subr.bf16.mxu1 (!%p1503_p11), %v2097_v57  ;;  %v554_v2 = vld [vmem:[#allocation10 + $0x20] sm:$0xff] (!%p1503_p11)  ;;  %v2109_v5 = vpack.c.bf16 (!%p1503_p11), %v565_v4, %v564_v3  ;;  %v567_v7 = vld [vmem:[%s3029_s19 + $0x48] sm:$0xff] (!%p1503_p11)  ;;  %v568_v9 = vld [vmem:[%s3029_s19 + $0x50] sm:$0xff] (!%p1503_p11) }
 0x1a3   : > { %2100 = vmatpush3.bf16.msra.mxu0 (!%p1503_p11), %v2097_v57  ;;  %2345 = vmatpush3.bf16.msra.mxu1 (!%p1503_p11), %v2097_v57  ;;  %v566_v6 = vld [vmem:[%s3029_s19 + $0x40] sm:$0xff] (!%p1503_p11)  ;;  %v569_v10 = vld [vmem:[%s3029_s19 + $0x58] sm:$0xff] (!%p1503_p11)  ;;  %v571_v13 = vld [vmem:[%s3029_s19 + $0x68] sm:$0xff] (!%p1503_p11)  ;;  %v577_v26 = vsub.s32 (!%p1503_p11), 0, %v576_v25 }
 0x1a4   : > { %2102 = vmatprep.subr.bf16.mxu0 (!%p1503_p11), %v2101_v59  ;;  %2338 = vmatprep.subr.bf16.mxu1 (!%p1503_p11), %v2101_v59  ;;  %v2113_v8 = vpack.c.bf16 (!%p1503_p11), %v567_v7, %v566_v6  ;;  %v2117_v11 = vpack.c.bf16 (!%p1503_p11), %v569_v10, %v568_v9  ;;  %v570_v12 = vld [vmem:[%s3029_s19 + $0x60] sm:$0xff] (!%p1503_p11)  ;;  %v572_v15 = vld [vmem:[%s3029_s19 + $0x70] sm:$0xff] (!%p1503_p11)  ;;  %v573_v16 = vld [vmem:[%s3029_s19 + $0x78] sm:$0xff] (!%p1503_p11) }
 0x1a5   : > { %1773 = vmatprep.mubr.f32.mxu0 (!%p1503_p11), %v550_v63  ;;  %1779 = vmatprep.mubr.f32.mxu1 (!%p1503_p11), %v554_v2  ;;  %v2121_v14 = vpack.c.bf16 (!%p1503_p11), %v571_v13, %v570_v12  ;;  %v2125_v17 = vpack.c.bf16 (!%p1503_p11), %v573_v16, %v572_v15  ;;  %v551_v18 = vld [vmem:[#allocation10 + $0x8] sm:$0xff] (!%p1503_p11)  ;;  %v552_v20 = vld [vmem:[#allocation10 + $0x10] sm:$0xff] (!%p1503_p11)  ;;  %v553_v22 = vld [vmem:[#allocation10 + $0x18] sm:$0xff] (!%p1503_p11)  ;;  %v578_v27 = vrot.slane (!%p1503_p11), %v3054_v1, %v577_v26 }
 0x1a6   : > { %v555_v19 = vld [vmem:[#allocation10 + $0x28] sm:$0xff] (!%p1503_p11)  ;;  %v556_v21 = vld [vmem:[#allocation10 + $0x30] sm:$0xff] (!%p1503_p11)  ;;  %v557_v23 = vld [vmem:[#allocation10 + $0x38] sm:$0xff] (!%p1503_p11) }
 0x1a7   : > { %2104 = vmatpush3.bf16.msra.mxu0 %v2101_v59  ;;  %2346 = vmatpush3.bf16.msra.mxu1 %v2101_v59 }
 0x1a8   : > { %2106 = vmatprep.subr.bf16.mxu0 %v2105_v62  ;;  %2339 = vmatprep.subr.bf16.mxu1 %v2105_v62 }
 0x1ab   : > { %2108 = vmatpush3.bf16.msra.mxu0 %v2105_v62  ;;  %2347 = vmatpush3.bf16.msra.mxu1 %v2105_v62 }
 0x1ac   : > { %2110 = vmatprep.subr.bf16.mxu0 %v2109_v5  ;;  %2340 = vmatprep.subr.bf16.mxu1 %v2109_v5 }
 0x1af   : > { %2112 = vmatpush3.bf16.msra.mxu0 %v2109_v5  ;;  %2348 = vmatpush3.bf16.msra.mxu1 %v2109_v5 }
 0x1b0   : > { %2114 = vmatprep.subr.bf16.mxu0 %v2113_v8  ;;  %2341 = vmatprep.subr.bf16.mxu1 %v2113_v8 }
 0x1b3   : > { %2116 = vmatpush3.bf16.msra.mxu0 %v2113_v8  ;;  %2349 = vmatpush3.bf16.msra.mxu1 %v2113_v8 }
 0x1b4   : > { %2118 = vmatprep.subr.bf16.mxu0 %v2117_v11  ;;  %2342 = vmatprep.subr.bf16.mxu1 %v2117_v11 }
 0x1b7   : > { %2120 = vmatpush3.bf16.msra.mxu0 %v2117_v11  ;;  %2350 = vmatpush3.bf16.msra.mxu1 %v2117_v11 }
 0x1b8   : > { %2122 = vmatprep.subr.bf16.mxu0 %v2121_v14  ;;  %2343 = vmatprep.subr.bf16.mxu1 %v2121_v14 }
 0x1bb   : > { %2124 = vmatpush3.bf16.msra.mxu0 %v2121_v14  ;;  %2351 = vmatpush3.bf16.msra.mxu1 %v2121_v14 }
 0x1bc   : > { %2126 = vmatprep.subr.bf16.mxu0 %v2125_v17  ;;  %2344 = vmatprep.subr.bf16.mxu1 %v2125_v17 }
 0x1bf   : > { %2128 = vmatpush3.bf16.msra.mxu0 %v2125_v17  ;;  %2352 = vmatpush3.bf16.msra.mxu1 %v2125_v17 }
 0x1c2   : > { %1774 = vmatmul.mubr.f32.vlgmr.msra.gmra.mrb[0].mxu0 %v551_v18  ;;  %1780 = vmatmul.mubr.f32.vlgmr.msra.gmra.mrb[0].mxu1 %v555_v19 }
 0x1c3   : > { %1776 = vmatprep.mubr.f32.mxu0 %v552_v20  ;;  %1782 = vmatprep.mubr.f32.mxu1 %v556_v21 }
 0x1c6   : > { %1777 = vmatmul.mubr.f32.gmra.mrb[2].mxu0 %v553_v22  ;;  %1783 = vmatmul.mubr.f32.gmra.mrb[2].mxu1 %v557_v23 }
 0x295   : > { %v1775_v28 = vpop.f32.mrb[0].mxu0  ;;  %v1781_v29 = vpop.f32.mrb[0].mxu1 }
 0x296   : > { %v652_v30 = vadd.f32 %v1775_v28, %v578_v27  ;;  %v672_v31 = vadd.f32 %v1781_v29, %v578_v27  ;;  %v646_v32 = vpop.f32.mrb[1].mxu0  ;;  %v666_v33 = vpop.f32.mrb[1].mxu1 }
 0x297   : > { %v647_v34 = vadd.f32 %v646_v32, %v578_v27  ;;  %v667_v35 = vadd.f32 %v666_v33, %v578_v27 }
 0x298   : > { %686 = vst [vmem:[#allocation10 + $0x8] sm:$0xff] %v652_v30  ;;  %690 = vst [vmem:[#allocation10 + $0x28] sm:$0xff] %v672_v31 }
 0x299   : > { %685 = vst [vmem:[#allocation10] sm:$0xff] %v647_v34  ;;  %689 = vst [vmem:[#allocation10 + $0x20] sm:$0xff] %v667_v35  ;;  %v1778_v36 = vpop.f32.mrb[2].mxu0  ;;  %v1784_v37 = vpop.f32.mrb[2].mxu1 }
 0x29a   : > { %v662_v38 = vadd.f32 %v1778_v36, %v578_v27  ;;  %v682_v39 = vadd.f32 %v1784_v37, %v578_v27  ;;  %v656_v40 = vpop.f32.mrb[3].mxu0  ;;  %v676_v41 = vpop.f32.mrb[3].mxu1 }
 0x29b   : > { %v657_v42 = vadd.f32 %v656_v40, %v578_v27  ;;  %v677_v1 = vadd.f32 %v676_v41, %v578_v27 }
 0x29c   : > { %688 = vst [vmem:[#allocation10 + $0x18] sm:$0xff] %v662_v38  ;;  %692 = vst [vmem:[#allocation10 + $0x38] sm:$0xff] %v682_v39 }
 0x29d   : > { %687 = vst [vmem:[#allocation10 + $0x10] sm:$0xff] %v657_v42  ;;  %691 = vst [vmem:[#allocation10 + $0x30] sm:$0xff] %v677_v1 }
 0x29e PF: > { %v693_v43 = vld [vmem:[%s3036_s17] sm:$0xff]  ;;  %v694_v44 = vld [vmem:[%s3036_s17 + $0x8] sm:$0xff]  ;;  %v695_v45 = vld [vmem:[%s3036_s17 + $0x10] sm:$0xff]  ;;  %v2763_v46 = vmov 0.0|0.0   ;;  %vm2764_vm0 = vmmov 0   ;;  %s2765_s7 = smov [#allocation10]  }
 0x29f   : > { %2129 = vmatprep.subr.bf16.mxu0 %v2763_v46  ;;  %v3080_v47 = vpack.c.bf16 %v694_v44, %v693_v43  ;;  %v696_v48 = vld [vmem:[%s3036_s17 + $0x18] sm:$0xff]  ;;  %1817 = vmatprep.mubr.msk.f32.mxu0 %vm2764_vm0, %v2762_v0  ;;  %v697_v50 = vld [vmem:[%s3036_s17 + $0x20] sm:$0xff]  ;;  %v698_v51 = vld [vmem:[%s3036_s17 + $0x28] sm:$0xff]  ;;  %s1327_s24 = sshll.u32 %s2765_s7, 4  ;;  %p2392_p4 = scmp.eq.s32.totalorder %s2841_s29, 1  ;;  %s1328_s24 = int_to_ptr.vmem [resolvable:$true] %s1327_s24 }
 0x2a0   : > { %2153 = vmatprep.subr.bf16.mxu1 %v2763_v46  ;;  %1852 = vmatprep.mubr.msk.f32.mxu1 %vm2764_vm0, %v2762_v0  ;;  %v3089_v49 = vpack.c.bf16 %v696_v48, %v695_v45  ;;  %v3097_v52 = vpack.c.bf16 %v698_v51, %v697_v50  ;;  %v699_v53 = vld [vmem:[%s3036_s17 + $0x30] sm:$0xff]  ;;  %v700_v54 = vld [vmem:[%s3036_s17 + $0x38] sm:$0xff]  ;;  %v701_v56 = vld [vmem:[%s3036_s17 + $0x40] sm:$0xff]  ;;  %s2766_s13 = smov [#allocation11]   ;;  %s1315_s9 = scalar_lea.vmem [#allocation11], %s1501_s5 }
 0x2a1   : > { %2131 = vmatpush3.bf16.msra.mxu0 %v3080_v47  ;;  %2155 = vmatpush3.bf16.msra.mxu1 %v3080_v47  ;;  %v3105_v55 = vpack.c.bf16 %v700_v54, %v699_v53  ;;  %v702_v57 = vld [vmem:[%s3036_s17 + $0x48] sm:$0xff]  ;;  %v703_v59 = vld [vmem:[%s3036_s17 + $0x50] sm:$0xff]  ;;  %v704_v60 = vld [vmem:[%s3036_s17 + $0x58] sm:$0xff]  ;;  %s1342_s15 = sshll.u32 %s2766_s13, 4  ;;  %s2611_s14 = scalar_lea.vmem %s1328_s24, 1024  ;;  %s3254_s15 = int_to_ptr.vmem [resolvable:$true] %s1342_s15 }
 0x2a2   : > { %2132 = vmatprep.subr.bf16.mxu0 %v2763_v46  ;;  %2156 = vmatprep.subr.bf16.mxu1 %v2763_v46  ;;  %v3113_v58 = vpack.c.bf16 %v702_v57, %v701_v56  ;;  %v3121_v61 = vpack.c.bf16 %v704_v60, %v703_v59  ;;  %v705_v62 = vld [vmem:[%s3036_s17 + $0x60] sm:$0xff]  ;;  %v706_v63 = vld [vmem:[%s3036_s17 + $0x68] sm:$0xff]  ;;  %v707_v3 = vld [vmem:[%s3036_s17 + $0x70] sm:$0xff]  ;;  %p2612_p1 = scmp.ne.s32.totalorder %s1328_s24, %s2611_s14  ;;  %p2618_p8 = scmp.lt.s32.totalorder %s1328_s24, %s1328_s24 }
 0x2a3   : > { %v3129_v2 = vpack.c.bf16 %v706_v63, %v705_v62  ;;  %v708_v4 = vld [vmem:[%s3036_s17 + $0x78] sm:$0xff]  ;;  %v711_v6 = vld [vmem:[%s3047_s30] sm:$0xff]  ;;  %v712_v7 = vld [vmem:[#allocation10] sm:$0xff]  ;;  %p2619_p5 = scmp.lt.s32.totalorder %s2611_s14, %s2611_s14 }
 0x2a4   : > { %v3137_v5 = vpack.c.bf16 %v708_v4, %v707_v3  ;;  %v787_v12 = vld [vmem:[#allocation10 + $0x8] sm:$0xff]  ;;  %v862_v17 = vld [vmem:[#allocation10 + $0x10] sm:$0xff]  ;;  %v937_v22 = vld [vmem:[#allocation10 + $0x18] sm:$0xff]  ;;  %p2613_p10 = pnand %p2612_p1, %p2392_p4 }
 0x2a5   : > { %2134 = vmatpush3.bf16.msra.mxu0 %v3089_v49  ;;  %2158 = vmatpush3.bf16.msra.mxu1 %v3089_v49  ;;  %v1012_v27 = vld [vmem:[#allocation10 + $0x20] sm:$0xff]  ;;  %v1162_v36 = vld [vmem:[#allocation10 + $0x30] sm:$0xff]  ;;  %v1237_v41 = vld [vmem:[#allocation10 + $0x38] sm:$0xff]  ;;  %p2620_p3 = por %p2619_p5, %p2618_p8 }
 0x2a6   : > { %2135 = vmatprep.subr.bf16.mxu0 %v2763_v46  ;;  %2159 = vmatprep.subr.bf16.mxu1 %v2763_v46  ;;  %p2614_p0 = pneg %p2613_p10 }
 0x2a8   : > { %p2621_p6 = pnand %p2620_p3, %p2614_p0 }
 0x2a9   : > { %2137 = vmatpush3.bf16.msra.mxu0 %v3097_v52  ;;  %2161 = vmatpush3.bf16.msra.mxu1 %v3097_v52 }
 0x2aa   : > { %2138 = vmatprep.subr.bf16.mxu0 %v2763_v46  ;;  %2162 = vmatprep.subr.bf16.mxu1 %v2763_v46 }
 0x2ad   : > { %2140 = vmatpush3.bf16.msra.mxu0 %v3105_v55  ;;  %2164 = vmatpush3.bf16.msra.mxu1 %v3105_v55 }
 0x2ae   : > { %2141 = vmatprep.subr.bf16.mxu0 %v2763_v46  ;;  %2165 = vmatprep.subr.bf16.mxu1 %v2763_v46 }
 0x2b1   : > { %2143 = vmatpush3.bf16.msra.mxu0 %v3113_v58  ;;  %2167 = vmatpush3.bf16.msra.mxu1 %v3113_v58 }
 0x2b2   : > { %2144 = vmatprep.subr.bf16.mxu0 %v2763_v46  ;;  %2168 = vmatprep.subr.bf16.mxu1 %v2763_v46 }
 0x2b5   : > { %2146 = vmatpush3.bf16.msra.mxu0 %v3121_v61  ;;  %2170 = vmatpush3.bf16.msra.mxu1 %v3121_v61 }
 0x2b6   : > { %2147 = vmatprep.subr.bf16.mxu0 %v2763_v46  ;;  %2171 = vmatprep.subr.bf16.mxu1 %v2763_v46 }
 0x2b9   : > { %2149 = vmatpush3.bf16.msra.mxu0 %v3129_v2  ;;  %2173 = vmatpush3.bf16.msra.mxu1 %v3129_v2 }
 0x2ba   : > { %2150 = vmatprep.subr.bf16.mxu0 %v2763_v46  ;;  %2174 = vmatprep.subr.bf16.mxu1 %v2763_v46 }
 0x2bd   : > { %2152 = vmatpush3.bf16.msra.mxu0 %v3137_v5  ;;  %2176 = vmatpush3.bf16.msra.mxu1 %v3137_v5 }
 0x2be   : > { %2177 = vmatprep.subr.bf16.mxu0 %v2763_v46  ;;  %2201 = vmatprep.subr.bf16.mxu1 %v2763_v46 }
 0x2c0   : > { %1818 = vmatmul.mubr.f32.vlgmr.msra.gmra.mrb[0].mxu0 %v711_v6 }
 0x2c1   : > { %2179 = vmatpush3.bf16.msra.mxu0 %v3080_v47  ;;  %1887 = vmatprep.mubr.msk.f32.mxu0 %vm2764_vm0, %v2762_v0 }
 0x2c2   : > { %2180 = vmatprep.subr.bf16.mxu0 %v2763_v46 }
 0x2c5   : > { %2182 = vmatpush3.bf16.msra.mxu0 %v3089_v49 }
 0x2c6   : > { %2183 = vmatprep.subr.bf16.mxu0 %v2763_v46 }
 0x2c9   : > { %2185 = vmatpush3.bf16.msra.mxu0 %v3097_v52 }
 0x2ca   : > { %2186 = vmatprep.subr.bf16.mxu0 %v2763_v46 }
 0x2cd   : > { %2188 = vmatpush3.bf16.msra.mxu0 %v3105_v55 }
 0x2ce   : > { %2189 = vmatprep.subr.bf16.mxu0 %v2763_v46 }
 0x2d1   : > { %2191 = vmatpush3.bf16.msra.mxu0 %v3113_v58 }
 0x2d2   : > { %2192 = vmatprep.subr.bf16.mxu0 %v2763_v46 }
 0x2d5   : > { %2194 = vmatpush3.bf16.msra.mxu0 %v3121_v61 }
 0x2d6   : > { %2195 = vmatprep.subr.bf16.mxu0 %v2763_v46 }
 0x2d9   : > { %2197 = vmatpush3.bf16.msra.mxu0 %v3129_v2 }
 0x2da   : > { %2198 = vmatprep.subr.bf16.mxu0 %v2763_v46 }
 0x2dd   : > { %2200 = vmatpush3.bf16.msra.mxu0 %v3137_v5 }
 0x2de   : > { %2225 = vmatprep.subr.bf16.mxu0 %v2763_v46 }
 0x393   : > { %v779_v8 = vpop.f32.mrb[0].mxu0 }
 0x394   : > { %v783_v9 = vadd.f32 %v779_v8, %v712_v7  ;;  %v1819_v10 = vpop.f32.mrb[1].mxu0 }
 0x396   : > { %2479 = vtanh.f32 %v783_v9 }
 0x3a0   : > { %v2480_v11 = vpop.eup %2479 }
 0x3a1   : > { %785 = vst [vmem:[#allocation10] sm:$0xff] %v2480_v11  ;;  %1853 = vmatmul.mubr.f32.vlgmr.msra.gmra.mrb[0].mxu1 %v2480_v11 }
 0x3a2   : > { %2203 = vmatpush3.bf16.msra.mxu1 %v3080_v47  ;;  %1922 = vmatprep.mubr.msk.f32.mxu1 %vm2764_vm0, %v2762_v0 }
 0x3a3   : > { %2204 = vmatprep.subr.bf16.mxu1 %v2763_v46 }
 0x3a6   : > { %2206 = vmatpush3.bf16.msra.mxu1 %v3089_v49 }
 0x3a7   : > { %2207 = vmatprep.subr.bf16.mxu1 %v2763_v46 }
 0x3aa   : > { %2209 = vmatpush3.bf16.msra.mxu1 %v3097_v52 }
 0x3ab   : > { %2210 = vmatprep.subr.bf16.mxu1 %v2763_v46 }
 0x3ae   : > { %2212 = vmatpush3.bf16.msra.mxu1 %v3105_v55 }
 0x3af   : > { %2213 = vmatprep.subr.bf16.mxu1 %v2763_v46 }
 0x3b2   : > { %2215 = vmatpush3.bf16.msra.mxu1 %v3113_v58 }
 0x3b3   : > { %2216 = vmatprep.subr.bf16.mxu1 %v2763_v46 }
 0x3b6   : > { %2218 = vmatpush3.bf16.msra.mxu1 %v3121_v61 }
 0x3b7   : > { %2219 = vmatprep.subr.bf16.mxu1 %v2763_v46 }
 0x3ba   : > { %2221 = vmatpush3.bf16.msra.mxu1 %v3129_v2 }
 0x3bb   : > { %2222 = vmatprep.subr.bf16.mxu1 %v2763_v46 }
 0x3be   : > { %2224 = vmatpush3.bf16.msra.mxu1 %v3137_v5 }
 0x3bf   : > { %2249 = vmatprep.subr.bf16.mxu1 %v2763_v46 }
 0x474   : > { %v854_v13 = vpop.f32.mrb[0].mxu1 }
 0x475   : > { %v858_v14 = vadd.f32 %v854_v13, %v787_v12  ;;  %v1854_v15 = vpop.f32.mrb[1].mxu1 }
 0x477   : > { %2481 = vtanh.f32 %v858_v14 }
 0x481   : > { %v2482_v16 = vpop.eup %2481 }
 0x482   : > { %860 = vst [vmem:[#allocation10 + $0x8] sm:$0xff] %v2482_v16  ;;  %1888 = vmatmul.mubr.f32.vlgmr.msra.gmra.mrb[2].mxu0 %v2482_v16 }
 0x483   : > { %2227 = vmatpush3.bf16.msra.mxu0 %v3080_v47  ;;  %1957 = vmatprep.mubr.msk.f32.mxu0 %vm2764_vm0, %v2762_v0 }
 0x484   : > { %2228 = vmatprep.subr.bf16.mxu0 %v2763_v46 }
 0x487   : > { %2230 = vmatpush3.bf16.msra.mxu0 %v3089_v49 }
 0x488   : > { %2231 = vmatprep.subr.bf16.mxu0 %v2763_v46 }
 0x48b   : > { %2233 = vmatpush3.bf16.msra.mxu0 %v3097_v52 }
 0x48c   : > { %2234 = vmatprep.subr.bf16.mxu0 %v2763_v46 }
 0x48f   : > { %2236 = vmatpush3.bf16.msra.mxu0 %v3105_v55 }
 0x490   : > { %2237 = vmatprep.subr.bf16.mxu0 %v2763_v46 }
 0x493   : > { %2239 = vmatpush3.bf16.msra.mxu0 %v3113_v58 }
 0x494   : > { %2240 = vmatprep.subr.bf16.mxu0 %v2763_v46 }
 0x497   : > { %2242 = vmatpush3.bf16.msra.mxu0 %v3121_v61 }
 0x498   : > { %2243 = vmatprep.subr.bf16.mxu0 %v2763_v46 }
 0x49b   : > { %2245 = vmatpush3.bf16.msra.mxu0 %v3129_v2 }
 0x49c   : > { %2246 = vmatprep.subr.bf16.mxu0 %v2763_v46 }
 0x49f   : > { %2248 = vmatpush3.bf16.msra.mxu0 %v3137_v5 }
 0x4a0   : > { %2273 = vmatprep.subr.bf16.mxu0 %v2763_v46 }
 0x555   : > { %v929_v18 = vpop.f32.mrb[2].mxu0 }
 0x556   : > { %v933_v19 = vadd.f32 %v929_v18, %v862_v17  ;;  %v1889_v20 = vpop.f32.mrb[3].mxu0 }
 0x558   : > { %2483 = vtanh.f32 %v933_v19 }
 0x562   : > { %v2484_v21 = vpop.eup %2483 }
 0x563   : > { %935 = vst [vmem:[#allocation10 + $0x10] sm:$0xff] %v2484_v21  ;;  %1923 = vmatmul.mubr.f32.vlgmr.msra.gmra.mrb[2].mxu1 %v2484_v21 }
 0x564   : > { %2251 = vmatpush3.bf16.msra.mxu1 %v3080_v47  ;;  %1992 = vmatprep.mubr.msk.f32.mxu1 %vm2764_vm0, %v2762_v0 }
 0x565   : > { %2252 = vmatprep.subr.bf16.mxu1 %v2763_v46 }
 0x568   : > { %2254 = vmatpush3.bf16.msra.mxu1 %v3089_v49 }
 0x569   : > { %2255 = vmatprep.subr.bf16.mxu1 %v2763_v46 }
 0x56c   : > { %2257 = vmatpush3.bf16.msra.mxu1 %v3097_v52 }
 0x56d   : > { %2258 = vmatprep.subr.bf16.mxu1 %v2763_v46 }
 0x570   : > { %2260 = vmatpush3.bf16.msra.mxu1 %v3105_v55 }
 0x571   : > { %2261 = vmatprep.subr.bf16.mxu1 %v2763_v46 }
 0x574   : > { %2263 = vmatpush3.bf16.msra.mxu1 %v3113_v58 }
 0x575   : > { %2264 = vmatprep.subr.bf16.mxu1 %v2763_v46 }
 0x578   : > { %2266 = vmatpush3.bf16.msra.mxu1 %v3121_v61 }
 0x579   : > { %2267 = vmatprep.subr.bf16.mxu1 %v2763_v46 }
 0x57c   : > { %2269 = vmatpush3.bf16.msra.mxu1 %v3129_v2 }
 0x57d   : > { %2270 = vmatprep.subr.bf16.mxu1 %v2763_v46 }
 0x580   : > { %2272 = vmatpush3.bf16.msra.mxu1 %v3137_v5 }
 0x581   : > { %2297 = vmatprep.subr.bf16.mxu1 %v2763_v46 }
 0x636   : > { %v1004_v23 = vpop.f32.mrb[2].mxu1 }
 0x637   : > { %v1008_v24 = vadd.f32 %v1004_v23, %v937_v22  ;;  %v1924_v25 = vpop.f32.mrb[3].mxu1 }
 0x639   : > { %2485 = vtanh.f32 %v1008_v24 }
 0x643   : > { %v2486_v26 = vpop.eup %2485 }
 0x644   : > { %1010 = vst [vmem:[#allocation10 + $0x18] sm:$0xff] %v2486_v26  ;;  %1958 = vmatmul.mubr.f32.vlgmr.msra.gmra.mrb[4].mxu0 %v2486_v26 }
 0x645   : > { %2275 = vmatpush3.bf16.msra.mxu0 %v3080_v47  ;;  %2027 = vmatprep.mubr.msk.f32.mxu0 %vm2764_vm0, %v2762_v0 }
 0x646   : > { %2276 = vmatprep.subr.bf16.mxu0 %v2763_v46 }
 0x649   : > { %2278 = vmatpush3.bf16.msra.mxu0 %v3089_v49 }
 0x64a   : > { %2279 = vmatprep.subr.bf16.mxu0 %v2763_v46 }
 0x64d   : > { %2281 = vmatpush3.bf16.msra.mxu0 %v3097_v52 }
 0x64e   : > { %2282 = vmatprep.subr.bf16.mxu0 %v2763_v46 }
 0x651   : > { %2284 = vmatpush3.bf16.msra.mxu0 %v3105_v55 }
 0x652   : > { %2285 = vmatprep.subr.bf16.mxu0 %v2763_v46 }
 0x655   : > { %2287 = vmatpush3.bf16.msra.mxu0 %v3113_v58 }
 0x656   : > { %2288 = vmatprep.subr.bf16.mxu0 %v2763_v46 }
 0x659   : > { %2290 = vmatpush3.bf16.msra.mxu0 %v3121_v61 }
 0x65a   : > { %2291 = vmatprep.subr.bf16.mxu0 %v2763_v46 }
 0x65d   : > { %2293 = vmatpush3.bf16.msra.mxu0 %v3129_v2 }
 0x65e   : > { %2294 = vmatprep.subr.bf16.mxu0 %v2763_v46 }
 0x661   : > { %2296 = vmatpush3.bf16.msra.mxu0 %v3137_v5 }
 0x717   : > { %v1079_v28 = vpop.f32.mrb[4].mxu0 }
 0x718   : > { %v1083_v29 = vadd.f32 %v1079_v28, %v1012_v27  ;;  %v1959_v30 = vpop.f32.mrb[5].mxu0 }
 0x71a   : > { %2487 = vtanh.f32 %v1083_v29 }
 0x724   : > { %v2488_v31 = vpop.eup %2487 }
 0x725   : > { %1085 = vst [vmem:[#allocation10 + $0x20] sm:$0xff] %v2488_v31  ;;  %1993 = vmatmul.mubr.f32.vlgmr.msra.gmra.mrb[4].mxu1 %v2488_v31 }
 0x726   : > { %2299 = vmatpush3.bf16.msra.mxu1 %v3080_v47  ;;  %2062 = vmatprep.mubr.msk.f32.mxu1 %vm2764_vm0, %v2762_v0  ;;  %v1087_v0 = vld [vmem:[#allocation10 + $0x28] sm:$0xff] }
 0x727   : > { %2300 = vmatprep.subr.bf16.mxu1 %v2763_v46 }
 0x72a   : > { %2302 = vmatpush3.bf16.msra.mxu1 %v3089_v49 }
 0x72b   : > { %2303 = vmatprep.subr.bf16.mxu1 %v2763_v46 }
 0x72e   : > { %2305 = vmatpush3.bf16.msra.mxu1 %v3097_v52 }
 0x72f   : > { %2306 = vmatprep.subr.bf16.mxu1 %v2763_v46 }
 0x732   : > { %2308 = vmatpush3.bf16.msra.mxu1 %v3105_v55 }
 0x733   : > { %2309 = vmatprep.subr.bf16.mxu1 %v2763_v46 }
 0x736   : > { %2311 = vmatpush3.bf16.msra.mxu1 %v3113_v58 }
 0x737   : > { %2312 = vmatprep.subr.bf16.mxu1 %v2763_v46 }
 0x73a   : > { %2314 = vmatpush3.bf16.msra.mxu1 %v3121_v61 }
 0x73b   : > { %2315 = vmatprep.subr.bf16.mxu1 %v2763_v46 }
 0x73e   : > { %2317 = vmatpush3.bf16.msra.mxu1 %v3129_v2 }
 0x73f   : > { %2318 = vmatprep.subr.bf16.mxu1 %v2763_v46 }
 0x742   : > { %2320 = vmatpush3.bf16.msra.mxu1 %v3137_v5 }
 0x7f8   : > { %v1154_v32 = vpop.f32.mrb[4].mxu1 }
 0x7f9   : > { %v1158_v33 = vadd.f32 %v1154_v32, %v1087_v0  ;;  %v1994_v34 = vpop.f32.mrb[5].mxu1 }
 0x7fb   : > { %2489 = vtanh.f32 %v1158_v33 }
 0x805   : > { %v2490_v35 = vpop.eup %2489 }
 0x806   : > { %1160 = vst [vmem:[#allocation10 + $0x28] sm:$0xff] %v2490_v35  ;;  %2028 = vmatmul.mubr.f32.vlgmr.msra.gmra.mrb[6].mxu0 %v2490_v35 }
 0x8d9   : > { %v1229_v37 = vpop.f32.mrb[6].mxu0 }
 0x8da   : > { %v1233_v38 = vadd.f32 %v1229_v37, %v1162_v36  ;;  %v2029_v39 = vpop.f32.mrb[7].mxu0 }
 0x8dc   : > { %2491 = vtanh.f32 %v1233_v38 }
 0x8e6   : > { %v2492_v40 = vpop.eup %2491 }
 0x8e7   : > { %1235 = vst [vmem:[#allocation10 + $0x30] sm:$0xff] %v2492_v40  ;;  %2063 = vmatmul.mubr.f32.vlgmr.msra.gmra.mrb[6].mxu1 %v2492_v40 }
 0x9ba   : > { %v1304_v42 = vpop.f32.mrb[6].mxu1 }
 0x9bb   : > { %v1308_v1 = vadd.f32 %v1304_v42, %v1237_v41  ;;  %v2064_v43 = vpop.f32.mrb[7].mxu1 }
 0x9bd   : > { %2493 = vtanh.f32 %v1308_v1 }
 0x9c7   : > { %v2494_v44 = vpop.eup %2493 }
 0x9c8   : > { %1310 = vst [vmem:[#allocation10 + $0x38] sm:$0xff] %v2494_v44  ;;  %1311 = vst [vmem:[%s3047_s30] sm:$0xff] %v2494_v44 }
 0x9c9   : > { %1316 = vst [vmem:[%s1315_s9] sm:$0xff] %v2494_v44 }
 0x9ca   : > { %2624 = shalt.err (!%p2621_p6)
}
 0x9cb   : > { %s3383_s8 = sld [smem:[#allocation21_spill]] }
 0x9d1   : > { %s2625_s19 = scalar_lea.hbm %s3383_s8, 1024 }
 0x9d2   : > { %p2626_p9 = scmp.ne.s32.totalorder %s3383_s8, %s2625_s19  ;;  %p2631_p12 = scmp.lt.u32.totalorder %s2625_s19, %s3383_s8 }
 0x9d4   : > { %p2627_p2 = pnand %p2626_p9, %p2392_p4 }
 0x9d6   : > { %p2628_p7 = pneg %p2627_p2 }
 0x9d8   : > { %p2633_p13 = pnand %p2631_p12, %p2628_p7 }
 0x9da   : > { %2636 = shalt.err (!%p2633_p13)
}
 0x9db   : > { %s2767_s5 = smov 128   ;;  %s2768_s6 = smov 8  }
 0x9dc   : > { %2366 = dma.vmem_to_hbm [thread:$0]  (%p2392_p4), %s1328_s24, 1024, %s3383_s8, [#allocation5], %s2767_s5, %s2767_s5, %s2768_s6  }
 0x9dd   : > { %s2637_s0 = scalar_lea.vmem %s3254_s15, 256  ;;  %p2644_p0 = scmp.lt.s32.totalorder %s3254_s15, %s3254_s15 }
 0x9de   : > { %p2638_p11 = scmp.ne.s32.totalorder %s3254_s15, %s2637_s0  ;;  %p2645_p8 = scmp.lt.s32.totalorder %s2637_s0, %s2637_s0 }
 0x9e0   : > { %p2639_p1 = pnand %p2638_p11, %p2392_p4  ;;  %p2646_p5 = por %p2645_p8, %p2644_p0 }
 0x9e2   : > { %p2640_p10 = pneg %p2639_p1 }
 0x9e4   : > { %p2647_p3 = pnand %p2646_p5, %p2640_p10 }
 0x9e6   : > { %2650 = shalt.err (!%p2647_p3)
}
 0x9e7   : > { %s3384_s13 = sld [smem:[#allocation22_spill]] }
 0x9ed   : > { %s2651_s9 = scalar_lea.hbm %s3384_s13, 256 }
 0x9ee   : > { %p2652_p6 = scmp.ne.s32.totalorder %s3384_s13, %s2651_s9  ;;  %p2657_p7 = scmp.lt.u32.totalorder %s2651_s9, %s3384_s13 }
 0x9f0   : > { %p2653_p9 = pnand %p2652_p6, %p2392_p4 }
 0x9f2   : > { %p2654_p2 = pneg %p2653_p9 }
 0x9f4   : > { %p2659_p12 = pnand %p2657_p7, %p2654_p2 }
 0x9f6   : > { %2662 = shalt.err (!%p2659_p12)
}
 0x9f7   : > { %2368 = dma.vmem_to_hbm [thread:$0]  (%p2392_p4), %s3254_s15, 256, %s3384_s13, [#allocation12], %s2767_s5, %s2767_s5, %s2768_s6  }
 0x9f8   : > { %2716 = dma.done.wait (%p2392_p4), [#allocation5], 1024  }
 0x9f9   : > { %2718 = vsyncadd (%p2392_p4), [#allocation5], 4294966272 }
 0x9fa   : > { %2720 = dma.done.wait (%p2392_p4), [#allocation12], 256  }
 0x9fb   : > { %2722 = vsyncadd (%p2392_p4), [#allocation12], 4294967040 }
 0x9fc PF: > { %s21_s28 = sadd.s32 1, %s2754_s28   ;;  %s3385_s15 = sld [smem:[#allocation19_spill]] }
 0x9fd   : > { %p18_p13 = scmp.ge.s32.totalorder %s21_s28, 4   ;;  %s3386_s21 = smov %s2730_s22 }
 0x9fe   : > { %s3387_s22 = smov %s2734_s23  ;;  %s3388_s23 = smov %s2969_s11 }
 0x9ff   : > { %s3389_s24 = smov %s2742_s25  ;;  %s3321_s25 = smov 0  }
 0xa00   : > { %s3390_s26 = smov %s2750_s27  ;;  %20 = sbr.rel (!%p18_p13) target bundleno = 11 (0xb), region = 135 }
 0xa02   : > { %s3391_s27 = smov %s3385_s15 }
 0xa07   :  { %1362 = vsyncpa [#allocation4], 1 }
 0xa08   :  { %1364 = vsyncpa [#allocation4 + $0x1], 1 }
 0xa09   :  { %1365 = vsyncpa [#allocation7], 1 }
 0xa0a   :  { %1366 = vsyncpa [#allocation5], 1 }
 0xa0b   :  { %1368 = vsyncpa [#allocation5 + $0x1], 1 }
 0xa0c   :  { %1369 = vsyncpa [#allocation12], 1 }

</bundles_post_ra>
